<compile_context>
chip_gen: v7x
topology: tpu7x:2x2x1
jax: 0.10.0
libtpu: 0.0.40
codegen_flags: <defaults>
</compile_context>

<pallas_src>
import functools

import jax
import jax.numpy as jnp
from jax.experimental import pallas as pl
from jax.experimental.pallas import tpu as pltpu

LN_EPS = 1e-5  # PyTorch nn.LayerNorm default


def _layernorm(x, gamma, beta):
    """Single-pass LayerNorm over the last dim (f32 math)."""
    h = x.shape[-1]
    inv_h = jnp.float32(1.0 / h)
    s1 = jnp.sum(x, axis=-1, keepdims=True)
    s2 = jnp.sum(x * x, axis=-1, keepdims=True)
    mean = s1 * inv_h
    var = jnp.maximum(s2 * inv_h - mean * mean, 0.0)
    return (x - mean) * jax.lax.rsqrt(var + LN_EPS) * gamma + beta


def critic_kernel(
    state_ref, action_ref,
    w1s_ref, b1s_ref,
    w2s_ref, b2s_ref,
    w1a_ref, b1a_ref,
    g1_ref, be1_ref,
    g2_ref, be2_ref,
    g3_ref, be3_ref,
    wj1s_ref, wj1a_ref, bj1_ref,
    wj2_ref, bj2_ref,
    wj3_ref, bj3_ref,
    out_ref,
):
    # Hoist all (1, H) parameter reads once per grid step.
    b1s = b1s_ref[...]
    b2s = b2s_ref[...]
    b1a = b1a_ref[...]
    bj1 = bj1_ref[...]
    bj2 = bj2_ref[...]
    bj3 = bj3_ref[...]
    g1, be1 = g1_ref[...], be1_ref[...]
    g2, be2 = g2_ref[...], be2_ref[...]
    g3, be3 = g3_ref[...], be3_ref[...]

    state_b = state_ref[...].astype(jnp.bfloat16)
    action_b = action_ref[...].astype(jnp.bfloat16)

    # s = relu(ln1(state_fc1(state)))   -- bf16 MXU operands, f32 accumulate.
    s = jnp.dot(state_b, w1s_ref[...], preferred_element_type=jnp.float32) + b1s
    s = jax.nn.relu(_layernorm(s, g1, be1))

    # s = relu(ln2(state_fc2(s)))
    s = jnp.dot(s.astype(jnp.bfloat16), w2s_ref[...],
                preferred_element_type=jnp.float32) + b2s
    s = jax.nn.relu(_layernorm(s, g2, be2))

    # a = relu(action_fc1(action))
    a = jnp.dot(action_b, w1a_ref[...], preferred_element_type=jnp.float32) + b1a
    a = jax.nn.relu(a)

    # x = relu(ln3(joint_fc1(cat([s, a], dim=1))))
    #   cat([s, a]) @ Wj1 == s @ Wj1[:H] + a @ Wj1[H:]
    x = (
        jnp.dot(s.astype(jnp.bfloat16), wj1s_ref[...],
                preferred_element_type=jnp.float32)
        + jnp.dot(a.astype(jnp.bfloat16), wj1a_ref[...],
                  preferred_element_type=jnp.float32)
        + bj1
    )
    x = jax.nn.relu(_layernorm(x, g3, be3))

    # x = relu(joint_fc2(x))
    x = jnp.dot(x.astype(jnp.bfloat16), wj2_ref[...],
                preferred_element_type=jnp.float32) + bj2
    x = jax.nn.relu(x)

    # x = joint_fc3(x)  -- N=1 output: keep off the MXU (VPU mul + lane reduce).
    w3 = wj3_ref[...]  # (1, H2), f32
    x = jnp.sum(x * w3, axis=-1, keepdims=True) + bj3
    out_ref[...] = x.astype(out_ref.dtype)


@functools.partial(jax.jit, static_argnames=("tb",))
def critic_forward(state, action, params, *, tb=32):
    batch = state.shape[0]
    state_dim = state.shape[1]
    action_dim = action.shape[1]
    h = params["w1s"].shape[1]
    h2 = params["wj2"].shape[1]

    # Pad batch up to a multiple of the batch tile (TB is a multiple of 8).
    n_tiles = pl.cdiv(batch, tb)
    padded = n_tiles * tb
    if padded != batch:
        pad = padded - batch
        state = jnp.pad(state, ((0, pad), (0, 0)))
        action = jnp.pad(action, ((0, pad), (0, 0)))

    args = (
        state, action,
        params["w1s"], params["b1s"],
        params["w2s"], params["b2s"],
        params["w1a"], params["b1a"],
        params["g1"], params["be1"],
        params["g2"], params["be2"],
        params["g3"], params["be3"],
        params["wj1_s"], params["wj1_a"], params["bj1"],
        params["wj2"], params["bj2"],
        params["wj3_row"], params["bj3"],
    )

    def batch_spec(feat):
        return pl.BlockSpec((tb, feat), lambda i: (i, 0))

    def const_spec(arr):
        # Full-array block, constant index_map -> stays VMEM-resident across
        # grid steps (no per-step re-DMA).
        return pl.BlockSpec(arr.shape, lambda i: (0, 0))

    in_specs = [
        batch_spec(state_dim), batch_spec(action_dim),
        const_spec(params["w1s"]), const_spec(params["b1s"]),
        const_spec(params["w2s"]), const_spec(params["b2s"]),
        const_spec(params["w1a"]), const_spec(params["b1a"]),
        const_spec(params["g1"]), const_spec(params["be1"]),
        const_spec(params["g2"]), const_spec(params["be2"]),
        const_spec(params["g3"]), const_spec(params["be3"]),
        const_spec(params["wj1_s"]), const_spec(params["wj1_a"]),
        const_spec(params["bj1"]),
        const_spec(params["wj2"]), const_spec(params["bj2"]),
        const_spec(params["wj3_row"]), const_spec(params["bj3"]),
    ]

    out = pl.pallas_call(
        critic_kernel,
        out_shape=jax.ShapeDtypeStruct((padded, 1), jnp.float32),
        grid=(n_tiles,),
        in_specs=in_specs,
        out_specs=pl.BlockSpec((tb, 1), lambda i: (i, 0)),
        compiler_params=pltpu.CompilerParams(
            dimension_semantics=("parallel",),
            vmem_limit_bytes=32 * 1024 * 1024,
        ),
    )(*args)
    return out[:batch]


# ------------------------- parameter initialization -------------------------

def _orthogonal(key, in_dim, out_dim):
    """Deterministic orthogonal init (mirrors nn.init.orthogonal_), returned
    in (in_dim, out_dim) layout so the kernel can do x @ W."""
    n = max(in_dim, out_dim)
    a = jax.random.normal(key, (n, n), jnp.float32)
    q, r = jnp.linalg.qr(a)
    q = q * jnp.sign(jnp.diag(r))[None, :]
    # PyTorch builds an orthogonal (out, in) matrix; transpose to (in, out).
    w_out_in = q[:out_dim, :in_dim]
    return jnp.asarray(w_out_in.T, jnp.float32)


def init_params(key, state_dim, action_dim, hidden_dim):
    ks = jax.random.split(key, 6)
    H, H2 = hidden_dim, hidden_dim // 2
    wj1 = _orthogonal(ks[3], 2 * H, H)  # (2H, H)
    bf16 = jnp.bfloat16
    params = {
        # MXU weights stored bf16; biases / LN params / last-layer row in f32.
        "w1s": _orthogonal(ks[0], state_dim, H).astype(bf16),
        "b1s": jnp.zeros((1, H), jnp.float32),
        "w2s": _orthogonal(ks[1], H, H).astype(bf16),
        "b2s": jnp.zeros((1, H), jnp.float32),
        "w1a": _orthogonal(ks[2], action_dim, H).astype(bf16),
        "b1a": jnp.zeros((1, H), jnp.float32),
        "wj1_s": wj1[:H, :].astype(bf16),
        "wj1_a": wj1[H:, :].astype(bf16),
        "bj1": jnp.zeros((1, H), jnp.float32),
        "wj2": _orthogonal(ks[4], H, H2).astype(bf16),
        "bj2": jnp.zeros((1, H2), jnp.float32),
        "wj3_row": _orthogonal(ks[5], H2, 1).reshape(1, H2),  # f32, VPU path
        "bj3": jnp.zeros((1, 1), jnp.float32),
        "g1": jnp.ones((1, H), jnp.float32), "be1": jnp.zeros((1, H), jnp.float32),
        "g2": jnp.ones((1, H), jnp.float32), "be2": jnp.zeros((1, H), jnp.float32),
        "g3": jnp.ones((1, H), jnp.float32), "be3": jnp.zeros((1, H), jnp.float32),
    }
    return params


# --------------------------- plain-JAX reference ----------------------------

def critic_reference(state, action, p):
    """Reference with the same bf16 matmul-operand behavior as the kernel."""

    def ln(x, g, b):
        m = jnp.mean(x, axis=-1, keepdims=True)
        v = jnp.mean((x - m) ** 2, axis=-1, keepdims=True)
        return (x - m) / jnp.sqrt(v + LN_EPS) * g + b

    def mm(x, w):
        return jnp.dot(x.astype(jnp.bfloat16), w,
                       preferred_element_type=jnp.float32)

    s = jax.nn.relu(ln(mm(state, p["w1s"]) + p["b1s"], p["g1"], p["be1"]))
    s = jax.nn.relu(ln(mm(s, p["w2s"]) + p["b2s"], p["g2"], p["be2"]))
    a = jax.nn.relu(mm(action, p["w1a"]) + p["b1a"])
    x = mm(s, p["wj1_s"]) + mm(a, p["wj1_a"]) + p["bj1"]
    x = jax.nn.relu(ln(x, p["g3"], p["be3"]))
    x = jax.nn.relu(mm(x, p["wj2"]) + p["bj2"])
    return x @ p["wj3_row"].T + p["bj3"]


if __name__ == "__main__":
    key = jax.random.PRNGKey(0)
    k_params, k_state, k_action = jax.random.split(key, 3)

    # Small, lane-friendly demo: module-default hidden_dim=256 (128-multiple),
    # batch tiled over a grid of 2 with TB=32.
    batch, state_dim, action_dim, hidden_dim = 64, 12, 6, 256

    params = init_params(k_params, state_dim, action_dim, hidden_dim)
    state = jax.random.normal(k_state, (batch, state_dim), jnp.float32)
    action = jax.random.normal(k_action, (batch, action_dim), jnp.float32)

    out = critic_forward(state, action, params, tb=32)
    out = jax.block_until_ready(out)

    ref = critic_reference(state, action, params)
    assert out.shape == (batch, 1), out.shape
    assert jnp.allclose(out, ref, atol=1e-2, rtol=1e-2), (out, ref)

    print("KERNEL_OK")
</pallas_src>

<mosaic_0001>
module attributes {stable_mosaic.version = 11 : i64} {
  func.func @critic_kernel(%arg0: i32, %arg1: memref<32x12xf32, #tpu.memory_space<vmem>>, %arg2: memref<32x6xf32, #tpu.memory_space<vmem>>, %arg3: memref<12x256xbf16, #tpu.memory_space<vmem>>, %arg4: memref<1x256xf32, #tpu.memory_space<vmem>>, %arg5: memref<256x256xbf16, #tpu.memory_space<vmem>>, %arg6: memref<1x256xf32, #tpu.memory_space<vmem>>, %arg7: memref<6x256xbf16, #tpu.memory_space<vmem>>, %arg8: memref<1x256xf32, #tpu.memory_space<vmem>>, %arg9: memref<1x256xf32, #tpu.memory_space<vmem>>, %arg10: memref<1x256xf32, #tpu.memory_space<vmem>>, %arg11: memref<1x256xf32, #tpu.memory_space<vmem>>, %arg12: memref<1x256xf32, #tpu.memory_space<vmem>>, %arg13: memref<1x256xf32, #tpu.memory_space<vmem>>, %arg14: memref<1x256xf32, #tpu.memory_space<vmem>>, %arg15: memref<256x256xbf16, #tpu.memory_space<vmem>>, %arg16: memref<256x256xbf16, #tpu.memory_space<vmem>>, %arg17: memref<1x256xf32, #tpu.memory_space<vmem>>, %arg18: memref<256x128xbf16, #tpu.memory_space<vmem>>, %arg19: memref<1x128xf32, #tpu.memory_space<vmem>>, %arg20: memref<1x128xf32, #tpu.memory_space<vmem>>, %arg21: memref<1x1xf32, #tpu.memory_space<vmem>>, %arg22: memref<32x1xf32, #tpu.memory_space<vmem>>) attributes {dimension_semantics = [#tpu.dimension_semantics<parallel>], iteration_bounds = array<i64: 2>, scalar_prefetch = 0 : i64, scratch_operands = 0 : i64, tpu.core_type = #tpu.core_type<tc>, window_params = [{transform_indices = @transform_0, window_bounds = array<i64: 32, 12>}, {transform_indices = @transform_1, window_bounds = array<i64: 32, 6>}, {pipeline_mode = #tpu.pipeline_mode<synchronous>, transform_indices = @transform_2, window_bounds = array<i64: 12, 256>}, {pipeline_mode = #tpu.pipeline_mode<synchronous>, transform_indices = @transform_3, window_bounds = array<i64: 1, 256>}, {pipeline_mode = #tpu.pipeline_mode<synchronous>, transform_indices = @transform_4, window_bounds = array<i64: 256, 256>}, {pipeline_mode = #tpu.pipeline_mode<synchronous>, transform_indices = @transform_5, window_bounds = array<i64: 1, 256>}, {pipeline_mode = #tpu.pipeline_mode<synchronous>, transform_indices = @transform_6, window_bounds = array<i64: 6, 256>}, {pipeline_mode = #tpu.pipeline_mode<synchronous>, transform_indices = @transform_7, window_bounds = array<i64: 1, 256>}, {pipeline_mode = #tpu.pipeline_mode<synchronous>, transform_indices = @transform_8, window_bounds = array<i64: 1, 256>}, {pipeline_mode = #tpu.pipeline_mode<synchronous>, transform_indices = @transform_9, window_bounds = array<i64: 1, 256>}, {pipeline_mode = #tpu.pipeline_mode<synchronous>, transform_indices = @transform_10, window_bounds = array<i64: 1, 256>}, {pipeline_mode = #tpu.pipeline_mode<synchronous>, transform_indices = @transform_11, window_bounds = array<i64: 1, 256>}, {pipeline_mode = #tpu.pipeline_mode<synchronous>, transform_indices = @transform_12, window_bounds = array<i64: 1, 256>}, {pipeline_mode = #tpu.pipeline_mode<synchronous>, transform_indices = @transform_13, window_bounds = array<i64: 1, 256>}, {pipeline_mode = #tpu.pipeline_mode<synchronous>, transform_indices = @transform_14, window_bounds = array<i64: 256, 256>}, {pipeline_mode = #tpu.pipeline_mode<synchronous>, transform_indices = @transform_15, window_bounds = array<i64: 256, 256>}, {pipeline_mode = #tpu.pipeline_mode<synchronous>, transform_indices = @transform_16, window_bounds = array<i64: 1, 256>}, {pipeline_mode = #tpu.pipeline_mode<synchronous>, transform_indices = @transform_17, window_bounds = array<i64: 256, 128>}, {pipeline_mode = #tpu.pipeline_mode<synchronous>, transform_indices = @transform_18, window_bounds = array<i64: 1, 128>}, {pipeline_mode = #tpu.pipeline_mode<synchronous>, transform_indices = @transform_19, window_bounds = array<i64: 1, 128>}, {pipeline_mode = #tpu.pipeline_mode<synchronous>, transform_indices = @transform_20, window_bounds = array<i64: 1, 1>}, {transform_indices = @transform_21, window_bounds = array<i64: 32, 1>}]} {
    %c0 = arith.constant 0 : index
    %c0_0 = arith.constant 0 : index
    %0 = vector.load %arg4[%c0, %c0_0] : memref<1x256xf32, #tpu.memory_space<vmem>>, vector<1x256xf32>
    %c0_1 = arith.constant 0 : index
    %c0_2 = arith.constant 0 : index
    %1 = vector.load %arg6[%c0_1, %c0_2] : memref<1x256xf32, #tpu.memory_space<vmem>>, vector<1x256xf32>
    %c0_3 = arith.constant 0 : index
    %c0_4 = arith.constant 0 : index
    %2 = vector.load %arg8[%c0_3, %c0_4] : memref<1x256xf32, #tpu.memory_space<vmem>>, vector<1x256xf32>
    %c0_5 = arith.constant 0 : index
    %c0_6 = arith.constant 0 : index
    %3 = vector.load %arg17[%c0_5, %c0_6] : memref<1x256xf32, #tpu.memory_space<vmem>>, vector<1x256xf32>
    %c0_7 = arith.constant 0 : index
    %c0_8 = arith.constant 0 : index
    %4 = vector.load %arg19[%c0_7, %c0_8] : memref<1x128xf32, #tpu.memory_space<vmem>>, vector<1x128xf32>
    %c0_9 = arith.constant 0 : index
    %c0_10 = arith.constant 0 : index
    %5 = vector.load %arg21[%c0_9, %c0_10] : memref<1x1xf32, #tpu.memory_space<vmem>>, vector<1x1xf32>
    %c0_11 = arith.constant 0 : index
    %c0_12 = arith.constant 0 : index
    %6 = vector.load %arg9[%c0_11, %c0_12] : memref<1x256xf32, #tpu.memory_space<vmem>>, vector<1x256xf32>
    %c0_13 = arith.constant 0 : index
    %c0_14 = arith.constant 0 : index
    %7 = vector.load %arg10[%c0_13, %c0_14] : memref<1x256xf32, #tpu.memory_space<vmem>>, vector<1x256xf32>
    %c0_15 = arith.constant 0 : index
    %c0_16 = arith.constant 0 : index
    %8 = vector.load %arg11[%c0_15, %c0_16] : memref<1x256xf32, #tpu.memory_space<vmem>>, vector<1x256xf32>
    %c0_17 = arith.constant 0 : index
    %c0_18 = arith.constant 0 : index
    %9 = vector.load %arg12[%c0_17, %c0_18] : memref<1x256xf32, #tpu.memory_space<vmem>>, vector<1x256xf32>
    %c0_19 = arith.constant 0 : index
    %c0_20 = arith.constant 0 : index
    %10 = vector.load %arg13[%c0_19, %c0_20] : memref<1x256xf32, #tpu.memory_space<vmem>>, vector<1x256xf32>
    %c0_21 = arith.constant 0 : index
    %c0_22 = arith.constant 0 : index
    %11 = vector.load %arg14[%c0_21, %c0_22] : memref<1x256xf32, #tpu.memory_space<vmem>>, vector<1x256xf32>
    %c0_23 = arith.constant 0 : index
    %c0_24 = arith.constant 0 : index
    %12 = vector.load %arg1[%c0_23, %c0_24] : memref<32x12xf32, #tpu.memory_space<vmem>>, vector<32x12xf32>
    %13 = arith.truncf %12 : vector<32x12xf32> to vector<32x12xbf16>
    %c0_25 = arith.constant 0 : index
    %c0_26 = arith.constant 0 : index
    %14 = vector.load %arg2[%c0_25, %c0_26] : memref<32x6xf32, #tpu.memory_space<vmem>>, vector<32x6xf32>
    %15 = arith.truncf %14 : vector<32x6xf32> to vector<32x6xbf16>
    %c0_27 = arith.constant 0 : index
    %c0_28 = arith.constant 0 : index
    %16 = vector.load %arg3[%c0_27, %c0_28] : memref<12x256xbf16, #tpu.memory_space<vmem>>, vector<12x256xbf16>
    %cst = arith.constant dense<0.000000e+00> : vector<32x256xf32>
    %17 = tpu.matmul %13, %16, %cst {dimension_numbers = #tpu.dot_dimension_numbers<[1], [0], [0], [1], [0, 0, 1, 1], [], []>} : vector<32x12xbf16>, vector<12x256xbf16>, vector<32x256xf32> -> vector<32x256xf32>
    %18 = vector.broadcast %0 : vector<1x256xf32> to vector<32x256xf32>
    %19 = arith.addf %17, %18 : vector<32x256xf32>
    %cst_29 = arith.constant dense<0.000000e+00> : vector<32xf32>
    %20 = vector.multi_reduction <add>, %19, %cst_29 [1] : vector<32x256xf32> to vector<32xf32>
    %21 = vector.shape_cast %20 : vector<32xf32> to vector<32x1xf32>
    %22 = arith.mulf %19, %19 : vector<32x256xf32>
    %cst_30 = arith.constant dense<0.000000e+00> : vector<32xf32>
    %23 = vector.multi_reduction <add>, %22, %cst_30 [1] : vector<32x256xf32> to vector<32xf32>
    %24 = vector.shape_cast %23 : vector<32xf32> to vector<32x1xf32>
    %cst_31 = arith.constant 3.906250e-03 : f32
    %25 = vector.broadcast %cst_31 : f32 to vector<32x1xf32>
    %26 = arith.mulf %21, %25 : vector<32x1xf32>
    %cst_32 = arith.constant 3.906250e-03 : f32
    %27 = vector.broadcast %cst_32 : f32 to vector<32x1xf32>
    %28 = arith.mulf %24, %27 : vector<32x1xf32>
    %29 = arith.mulf %26, %26 : vector<32x1xf32>
    %30 = arith.subf %28, %29 : vector<32x1xf32>
    %cst_33 = arith.constant 0.000000e+00 : f32
    %31 = vector.broadcast %cst_33 : f32 to vector<32x1xf32>
    %32 = arith.maximumf %30, %31 : vector<32x1xf32>
    %33 = vector.broadcast %26 : vector<32x1xf32> to vector<32x256xf32>
    %34 = arith.subf %19, %33 : vector<32x256xf32>
    %cst_34 = arith.constant 9.99999974E-6 : f32
    %35 = vector.broadcast %cst_34 : f32 to vector<32x1xf32>
    %36 = arith.addf %32, %35 : vector<32x1xf32>
    %37 = math.rsqrt %36 : vector<32x1xf32>
    %38 = vector.broadcast %37 : vector<32x1xf32> to vector<32x256xf32>
    %39 = arith.mulf %34, %38 : vector<32x256xf32>
    %40 = vector.broadcast %6 : vector<1x256xf32> to vector<32x256xf32>
    %41 = arith.mulf %39, %40 : vector<32x256xf32>
    %42 = vector.broadcast %7 : vector<1x256xf32> to vector<32x256xf32>
    %43 = arith.addf %41, %42 : vector<32x256xf32>
    %cst_35 = arith.constant 0.000000e+00 : f32
    %44 = vector.broadcast %cst_35 : f32 to vector<32x256xf32>
    %45 = arith.maximumf %43, %44 : vector<32x256xf32>
    %46 = arith.truncf %45 : vector<32x256xf32> to vector<32x256xbf16>
    %c0_36 = arith.constant 0 : index
    %c0_37 = arith.constant 0 : index
    %47 = vector.load %arg5[%c0_36, %c0_37] : memref<256x256xbf16, #tpu.memory_space<vmem>>, vector<256x256xbf16>
    %cst_38 = arith.constant dense<0.000000e+00> : vector<32x256xf32>
    %48 = tpu.matmul %46, %47, %cst_38 {dimension_numbers = #tpu.dot_dimension_numbers<[1], [0], [0], [1], [0, 0, 1, 1], [], []>} : vector<32x256xbf16>, vector<256x256xbf16>, vector<32x256xf32> -> vector<32x256xf32>
    %49 = vector.broadcast %1 : vector<1x256xf32> to vector<32x256xf32>
    %50 = arith.addf %48, %49 : vector<32x256xf32>
    %cst_39 = arith.constant dense<0.000000e+00> : vector<32xf32>
    %51 = vector.multi_reduction <add>, %50, %cst_39 [1] : vector<32x256xf32> to vector<32xf32>
    %52 = vector.shape_cast %51 : vector<32xf32> to vector<32x1xf32>
    %53 = arith.mulf %50, %50 : vector<32x256xf32>
    %cst_40 = arith.constant dense<0.000000e+00> : vector<32xf32>
    %54 = vector.multi_reduction <add>, %53, %cst_40 [1] : vector<32x256xf32> to vector<32xf32>
    %55 = vector.shape_cast %54 : vector<32xf32> to vector<32x1xf32>
    %cst_41 = arith.constant 3.906250e-03 : f32
    %56 = vector.broadcast %cst_41 : f32 to vector<32x1xf32>
    %57 = arith.mulf %52, %56 : vector<32x1xf32>
    %cst_42 = arith.constant 3.906250e-03 : f32
    %58 = vector.broadcast %cst_42 : f32 to vector<32x1xf32>
    %59 = arith.mulf %55, %58 : vector<32x1xf32>
    %60 = arith.mulf %57, %57 : vector<32x1xf32>
    %61 = arith.subf %59, %60 : vector<32x1xf32>
    %cst_43 = arith.constant 0.000000e+00 : f32
    %62 = vector.broadcast %cst_43 : f32 to vector<32x1xf32>
    %63 = arith.maximumf %61, %62 : vector<32x1xf32>
    %64 = vector.broadcast %57 : vector<32x1xf32> to vector<32x256xf32>
    %65 = arith.subf %50, %64 : vector<32x256xf32>
    %cst_44 = arith.constant 9.99999974E-6 : f32
    %66 = vector.broadcast %cst_44 : f32 to vector<32x1xf32>
    %67 = arith.addf %63, %66 : vector<32x1xf32>
    %68 = math.rsqrt %67 : vector<32x1xf32>
    %69 = vector.broadcast %68 : vector<32x1xf32> to vector<32x256xf32>
    %70 = arith.mulf %65, %69 : vector<32x256xf32>
    %71 = vector.broadcast %8 : vector<1x256xf32> to vector<32x256xf32>
    %72 = arith.mulf %70, %71 : vector<32x256xf32>
    %73 = vector.broadcast %9 : vector<1x256xf32> to vector<32x256xf32>
    %74 = arith.addf %72, %73 : vector<32x256xf32>
    %cst_45 = arith.constant 0.000000e+00 : f32
    %75 = vector.broadcast %cst_45 : f32 to vector<32x256xf32>
    %76 = arith.maximumf %74, %75 : vector<32x256xf32>
    %c0_46 = arith.constant 0 : index
    %c0_47 = arith.constant 0 : index
    %77 = vector.load %arg7[%c0_46, %c0_47] : memref<6x256xbf16, #tpu.memory_space<vmem>>, vector<6x256xbf16>
    %cst_48 = arith.constant dense<0.000000e+00> : vector<32x256xf32>
    %78 = tpu.matmul %15, %77, %cst_48 {dimension_numbers = #tpu.dot_dimension_numbers<[1], [0], [0], [1], [0, 0, 1, 1], [], []>} : vector<32x6xbf16>, vector<6x256xbf16>, vector<32x256xf32> -> vector<32x256xf32>
    %79 = vector.broadcast %2 : vector<1x256xf32> to vector<32x256xf32>
    %80 = arith.addf %78, %79 : vector<32x256xf32>
    %cst_49 = arith.constant 0.000000e+00 : f32
    %81 = vector.broadcast %cst_49 : f32 to vector<32x256xf32>
    %82 = arith.maximumf %80, %81 : vector<32x256xf32>
    %83 = arith.truncf %76 : vector<32x256xf32> to vector<32x256xbf16>
    %c0_50 = arith.constant 0 : index
    %c0_51 = arith.constant 0 : index
    %84 = vector.load %arg15[%c0_50, %c0_51] : memref<256x256xbf16, #tpu.memory_space<vmem>>, vector<256x256xbf16>
    %cst_52 = arith.constant dense<0.000000e+00> : vector<32x256xf32>
    %85 = tpu.matmul %83, %84, %cst_52 {dimension_numbers = #tpu.dot_dimension_numbers<[1], [0], [0], [1], [0, 0, 1, 1], [], []>} : vector<32x256xbf16>, vector<256x256xbf16>, vector<32x256xf32> -> vector<32x256xf32>
    %86 = arith.truncf %82 : vector<32x256xf32> to vector<32x256xbf16>
    %c0_53 = arith.constant 0 : index
    %c0_54 = arith.constant 0 : index
    %87 = vector.load %arg16[%c0_53, %c0_54] : memref<256x256xbf16, #tpu.memory_space<vmem>>, vector<256x256xbf16>
    %cst_55 = arith.constant dense<0.000000e+00> : vector<32x256xf32>
    %88 = tpu.matmul %86, %87, %cst_55 {dimension_numbers = #tpu.dot_dimension_numbers<[1], [0], [0], [1], [0, 0, 1, 1], [], []>} : vector<32x256xbf16>, vector<256x256xbf16>, vector<32x256xf32> -> vector<32x256xf32>
    %89 = arith.addf %85, %88 : vector<32x256xf32>
    %90 = vector.broadcast %3 : vector<1x256xf32> to vector<32x256xf32>
    %91 = arith.addf %89, %90 : vector<32x256xf32>
    %cst_56 = arith.constant dense<0.000000e+00> : vector<32xf32>
    %92 = vector.multi_reduction <add>, %91, %cst_56 [1] : vector<32x256xf32> to vector<32xf32>
    %93 = vector.shape_cast %92 : vector<32xf32> to vector<32x1xf32>
    %94 = arith.mulf %91, %91 : vector<32x256xf32>
    %cst_57 = arith.constant dense<0.000000e+00> : vector<32xf32>
    %95 = vector.multi_reduction <add>, %94, %cst_57 [1] : vector<32x256xf32> to vector<32xf32>
    %96 = vector.shape_cast %95 : vector<32xf32> to vector<32x1xf32>
    %cst_58 = arith.constant 3.906250e-03 : f32
    %97 = vector.broadcast %cst_58 : f32 to vector<32x1xf32>
    %98 = arith.mulf %93, %97 : vector<32x1xf32>
    %cst_59 = arith.constant 3.906250e-03 : f32
    %99 = vector.broadcast %cst_59 : f32 to vector<32x1xf32>
    %100 = arith.mulf %96, %99 : vector<32x1xf32>
    %101 = arith.mulf %98, %98 : vector<32x1xf32>
    %102 = arith.subf %100, %101 : vector<32x1xf32>
    %cst_60 = arith.constant 0.000000e+00 : f32
    %103 = vector.broadcast %cst_60 : f32 to vector<32x1xf32>
    %104 = arith.maximumf %102, %103 : vector<32x1xf32>
    %105 = vector.broadcast %98 : vector<32x1xf32> to vector<32x256xf32>
    %106 = arith.subf %91, %105 : vector<32x256xf32>
    %cst_61 = arith.constant 9.99999974E-6 : f32
    %107 = vector.broadcast %cst_61 : f32 to vector<32x1xf32>
    %108 = arith.addf %104, %107 : vector<32x1xf32>
    %109 = math.rsqrt %108 : vector<32x1xf32>
    %110 = vector.broadcast %109 : vector<32x1xf32> to vector<32x256xf32>
    %111 = arith.mulf %106, %110 : vector<32x256xf32>
    %112 = vector.broadcast %10 : vector<1x256xf32> to vector<32x256xf32>
    %113 = arith.mulf %111, %112 : vector<32x256xf32>
    %114 = vector.broadcast %11 : vector<1x256xf32> to vector<32x256xf32>
    %115 = arith.addf %113, %114 : vector<32x256xf32>
    %cst_62 = arith.constant 0.000000e+00 : f32
    %116 = vector.broadcast %cst_62 : f32 to vector<32x256xf32>
    %117 = arith.maximumf %115, %116 : vector<32x256xf32>
    %118 = arith.truncf %117 : vector<32x256xf32> to vector<32x256xbf16>
    %c0_63 = arith.constant 0 : index
    %c0_64 = arith.constant 0 : index
    %119 = vector.load %arg18[%c0_63, %c0_64] : memref<256x128xbf16, #tpu.memory_space<vmem>>, vector<256x128xbf16>
    %cst_65 = arith.constant dense<0.000000e+00> : vector<32x128xf32>
    %120 = tpu.matmul %118, %119, %cst_65 {dimension_numbers = #tpu.dot_dimension_numbers<[1], [0], [0], [1], [0, 0, 1, 1], [], []>} : vector<32x256xbf16>, vector<256x128xbf16>, vector<32x128xf32> -> vector<32x128xf32>
    %121 = vector.broadcast %4 : vector<1x128xf32> to vector<32x128xf32>
    %122 = arith.addf %120, %121 : vector<32x128xf32>
    %cst_66 = arith.constant 0.000000e+00 : f32
    %123 = vector.broadcast %cst_66 : f32 to vector<32x128xf32>
    %124 = arith.maximumf %122, %123 : vector<32x128xf32>
    %c0_67 = arith.constant 0 : index
    %c0_68 = arith.constant 0 : index
    %125 = vector.load %arg20[%c0_67, %c0_68] : memref<1x128xf32, #tpu.memory_space<vmem>>, vector<1x128xf32>
    %126 = vector.broadcast %125 : vector<1x128xf32> to vector<32x128xf32>
    %127 = arith.mulf %124, %126 : vector<32x128xf32>
    %cst_69 = arith.constant dense<0.000000e+00> : vector<32xf32>
    %128 = vector.multi_reduction <add>, %127, %cst_69 [1] : vector<32x128xf32> to vector<32xf32>
    %129 = vector.shape_cast %128 : vector<32xf32> to vector<32x1xf32>
    %130 = vector.broadcast %5 : vector<1x1xf32> to vector<32x1xf32>
    %131 = arith.addf %129, %130 : vector<32x1xf32>
    %c0_70 = arith.constant 0 : index
    %c0_71 = arith.constant 0 : index
    %132 = vector.load %arg22[%c0_70, %c0_71] : memref<32x1xf32, #tpu.memory_space<vmem>>, vector<32x1xf32>
    tpu.vector_store %arg22[%c0_70, %c0_71], %131 {strides = array<i32>} : memref<32x1xf32, #tpu.memory_space<vmem>>, vector<32x1xf32>,
    return
  }
  func.func @transform_0(%arg0: i32) -> (i32, i32) {
    %c0_i32 = arith.constant 0 : i32
    %c0_i32_0 = arith.constant 0 : i32
    return %arg0, %c0_i32 : i32, i32
  }
  func.func @transform_1(%arg0: i32) -> (i32, i32) {
    %c0_i32 = arith.constant 0 : i32
    %c0_i32_0 = arith.constant 0 : i32
    return %arg0, %c0_i32 : i32, i32
  }
  func.func @transform_2(%arg0: i32) -> (i32, i32) {
    %c0_i32 = arith.constant 0 : i32
    %c0_i32_0 = arith.constant 0 : i32
    %c0_i32_1 = arith.constant 0 : i32
    return %c0_i32, %c0_i32_0 : i32, i32
  }
  func.func @transform_3(%arg0: i32) -> (i32, i32) {
    %c0_i32 = arith.constant 0 : i32
    %c0_i32_0 = arith.constant 0 : i32
    %c0_i32_1 = arith.constant 0 : i32
    return %c0_i32, %c0_i32_0 : i32, i32
  }
  func.func @transform_4(%arg0: i32) -> (i32, i32) {
    %c0_i32 = arith.constant 0 : i32
    %c0_i32_0 = arith.constant 0 : i32
    %c0_i32_1 = arith.constant 0 : i32
    return %c0_i32, %c0_i32_0 : i32, i32
  }
  func.func @transform_5(%arg0: i32) -> (i32, i32) {
    %c0_i32 = arith.constant 0 : i32
    %c0_i32_0 = arith.constant 0 : i32
    %c0_i32_1 = arith.constant 0 : i32
    return %c0_i32, %c0_i32_0 : i32, i32
  }
  func.func @transform_6(%arg0: i32) -> (i32, i32) {
    %c0_i32 = arith.constant 0 : i32
    %c0_i32_0 = arith.constant 0 : i32
    %c0_i32_1 = arith.constant 0 : i32
    return %c0_i32, %c0_i32_0 : i32, i32
  }
  func.func @transform_7(%arg0: i32) -> (i32, i32) {
    %c0_i32 = arith.constant 0 : i32
    %c0_i32_0 = arith.constant 0 : i32
    %c0_i32_1 = arith.constant 0 : i32
    return %c0_i32, %c0_i32_0 : i32, i32
  }
  func.func @transform_8(%arg0: i32) -> (i32, i32) {
    %c0_i32 = arith.constant 0 : i32
    %c0_i32_0 = arith.constant 0 : i32
    %c0_i32_1 = arith.constant 0 : i32
    return %c0_i32, %c0_i32_0 : i32, i32
  }
  func.func @transform_9(%arg0: i32) -> (i32, i32) {
    %c0_i32 = arith.constant 0 : i32
    %c0_i32_0 = arith.constant 0 : i32
    %c0_i32_1 = arith.constant 0 : i32
    return %c0_i32, %c0_i32_0 : i32, i32
  }
  func.func @transform_10(%arg0: i32) -> (i32, i32) {
    %c0_i32 = arith.constant 0 : i32
    %c0_i32_0 = arith.constant 0 : i32
    %c0_i32_1 = arith.constant 0 : i32
    return %c0_i32, %c0_i32_0 : i32, i32
  }
  func.func @transform_11(%arg0: i32) -> (i32, i32) {
    %c0_i32 = arith.constant 0 : i32
    %c0_i32_0 = arith.constant 0 : i32
    %c0_i32_1 = arith.constant 0 : i32
    return %c0_i32, %c0_i32_0 : i32, i32
  }
  func.func @transform_12(%arg0: i32) -> (i32, i32) {
    %c0_i32 = arith.constant 0 : i32
    %c0_i32_0 = arith.constant 0 : i32
    %c0_i32_1 = arith.constant 0 : i32
    return %c0_i32, %c0_i32_0 : i32, i32
  }
  func.func @transform_13(%arg0: i32) -> (i32, i32) {
    %c0_i32 = arith.constant 0 : i32
    %c0_i32_0 = arith.constant 0 : i32
    %c0_i32_1 = arith.constant 0 : i32
    return %c0_i32, %c0_i32_0 : i32, i32
  }
  func.func @transform_14(%arg0: i32) -> (i32, i32) {
    %c0_i32 = arith.constant 0 : i32
    %c0_i32_0 = arith.constant 0 : i32
    %c0_i32_1 = arith.constant 0 : i32
    return %c0_i32, %c0_i32_0 : i32, i32
  }
  func.func @transform_15(%arg0: i32) -> (i32, i32) {
    %c0_i32 = arith.constant 0 : i32
    %c0_i32_0 = arith.constant 0 : i32
    %c0_i32_1 = arith.constant 0 : i32
    return %c0_i32, %c0_i32_0 : i32, i32
  }
  func.func @transform_16(%arg0: i32) -> (i32, i32) {
    %c0_i32 = arith.constant 0 : i32
    %c0_i32_0 = arith.constant 0 : i32
    %c0_i32_1 = arith.constant 0 : i32
    return %c0_i32, %c0_i32_0 : i32, i32
  }
  func.func @transform_17(%arg0: i32) -> (i32, i32) {
    %c0_i32 = arith.constant 0 : i32
    %c0_i32_0 = arith.constant 0 : i32
    %c0_i32_1 = arith.constant 0 : i32
    return %c0_i32, %c0_i32_0 : i32, i32
  }
  func.func @transform_18(%arg0: i32) -> (i32, i32) {
    %c0_i32 = arith.constant 0 : i32
    %c0_i32_0 = arith.constant 0 : i32
    %c0_i32_1 = arith.constant 0 : i32
    return %c0_i32, %c0_i32_0 : i32, i32
  }
  func.func @transform_19(%arg0: i32) -> (i32, i32) {
    %c0_i32 = arith.constant 0 : i32
    %c0_i32_0 = arith.constant 0 : i32
    %c0_i32_1 = arith.constant 0 : i32
    return %c0_i32, %c0_i32_0 : i32, i32
  }
  func.func @transform_20(%arg0: i32) -> (i32, i32) {
    %c0_i32 = arith.constant 0 : i32
    %c0_i32_0 = arith.constant 0 : i32
    %c0_i32_1 = arith.constant 0 : i32
    return %c0_i32, %c0_i32_0 : i32, i32
  }
  func.func @transform_21(%arg0: i32) -> (i32, i32) {
    %c0_i32 = arith.constant 0 : i32
    %c0_i32_0 = arith.constant 0 : i32
    return %arg0, %c0_i32 : i32, i32
  }
}

</mosaic_0001>

<bundles_post_ra>
// kernel: critic_forward.1
= control target key start
LH: loop header
LB: loop body
LE: loop exit
PB: predicated region body
PF: predicated region fallthrough
CT: control target
= control target key end

     0   :  { %s3436_s0 = inlined_call_operand.vmem [shape: f32[64,12], index: 0, kind: input, shape index: {}]   ;;  %s3437_s1 = inlined_call_operand.vmem [shape: f32[64,6], index: 1, kind: input, shape index: {}]   ;;  %s3438_s2 = inlined_call_operand.vmem [shape: bf16[12,256], index: 2, kind: input, shape index: {}]   ;;  %s3439_s3 = inlined_call_operand.vmem [shape: f32[1,256], index: 3, kind: input, shape index: {}]   ;;  %s3440_s4 = inlined_call_operand.hbm [shape: bf16[256,256], index: 4, kind: input, shape index: {}]   ;;  %s3441_s5 = inlined_call_operand.vmem [shape: f32[1,256], index: 5, kind: input, shape index: {}]   ;;  %s3442_s6 = inlined_call_operand.vmem [shape: bf16[6,256], index: 6, kind: input, shape index: {}]   ;;  %s3443_s7 = inlined_call_operand.vmem [shape: f32[1,256], index: 7, kind: input, shape index: {}]   ;;  %s3444_s8 = inlined_call_operand.vmem [shape: f32[1,256], index: 8, kind: input, shape index: {}]   ;;  %s3445_s9 = inlined_call_operand.vmem [shape: f32[1,256], index: 9, kind: input, shape index: {}]   ;;  %s3446_s10 = inlined_call_operand.vmem [shape: f32[1,256], index: 10, kind: input, shape index: {}]   ;;  %s3447_s11 = inlined_call_operand.vmem [shape: f32[1,256], index: 11, kind: input, shape index: {}]   ;;  %s3448_s12 = inlined_call_operand.vmem [shape: f32[1,256], index: 12, kind: input, shape index: {}]   ;;  %s3449_s13 = inlined_call_operand.vmem [shape: f32[1,256], index: 13, kind: input, shape index: {}]   ;;  %s3450_s14 = inlined_call_operand.hbm [shape: bf16[256,256], index: 14, kind: input, shape index: {}]   ;;  %s3451_s15 = inlined_call_operand.hbm [shape: bf16[256,256], index: 15, kind: input, shape index: {}]   ;;  %s3452_s16 = inlined_call_operand.vmem [shape: f32[1,256], index: 16, kind: input, shape index: {}]   ;;  %s3453_s17 = inlined_call_operand.vmem [shape: bf16[256,128], index: 17, kind: input, shape index: {}]   ;;  %s3454_s18 = inlined_call_operand.vmem [shape: f32[1,128], index: 18, kind: input, shape index: {}]   ;;  %s3455_s19 = inlined_call_operand.vmem [shape: f32[1,128], index: 19, kind: input, shape index: {}]   ;;  %s3456_s20 = inlined_call_operand.<no memory space> [shape: f32[1,1], index: 20, kind: input, shape index: {}]   ;;  %s3457_s21 = inlined_call_operand.vmem [shape: f32[64,1], index: 21, kind: output, shape index: {}]  }
   0x1   :  { %3464 = sst [smem:[#allocation10_spill]] %s3436_s0  ;;  %v26_v0 = vstv %s3456_s20 }
   0x2   :  { %3465 = sst [smem:[#allocation11_spill]] %s3437_s1  ;;  %27 = vst [vmem:[#allocation2] sm:$0x1] %v26_v0 }
   0x3   :  { %3466 = sst [smem:[#allocation12_spill]] %s3438_s2 }
   0x4   :  { %3467 = sst [smem:[#allocation13_spill]] %s3439_s3 }
   0x5   :  { %3468 = sst [smem:[#allocation14_spill]] %s3440_s4 }
   0x6   :  { %3469 = sst [smem:[#allocation15_spill]] %s3441_s5 }
   0x7   :  { %3470 = sst [smem:[#allocation16_spill]] %s3449_s13 }
   0x8   :  { %3471 = sst [smem:[#allocation17_spill]] %s3454_s18 }
   0x9   :  { %3472 = sst [smem:[#allocation18_spill]] %s3455_s19 }
   0xa   :  { %3473 = sst [smem:[#allocation19_spill]] %s3457_s21 }
   0xb   :  { %28 = vsyncpa [#allocation4], 0 }
   0xc   :  { %29 = vsyncpa [#allocation6], 0  ;;  %s3030_s26 = smov 0  }
   0xd LB: > { %s3463_s27 = sadd.s32 4294967295, %s2909_s26   ;;  %p2402_p0 = scmp.ge.s32.totalorder %s2909_s26, 1  ;;  %s2909_s26 = sphi %s3030_s26, %s35_s26  }
   0xe   : > { %p517_p1 = scmp.lt.s32.totalorder %s2909_s26, 3  ;;  %p3040_p2 = scmp.eq.s32.totalorder %s3463_s27, 0 }
   0xf   : > { %s2911_s28 = smov [#allocation5]   ;;  %s2912_s0 = smov [#allocation3]  }
  0x10   : > { %s3474_s20 = scalar_select %p3040_p2, 1, 0 }
  0x11   : > { %p3044_p3 = pnand %p2402_p0, %p517_p1  ;;  %s575_s29 = sshll.u32 %s2911_s28, 4  ;;  %s576_s29 = int_to_ptr.vmem [resolvable:$true] %s575_s29 }
  0x12   : > { %s535_s4 = sshll.u32 %s2912_s0, 4  ;;  %s2913_s5 = smov [#allocation7]   ;;  %s3056_s4 = int_to_ptr.vmem [resolvable:$true] %s535_s4 }
  0x13   : > { %s3475_s3 = scalar_select %p3044_p3, 1, 0 }
  0x14   : > { %p2592_p4 = pneg %p3044_p3  ;;  %s588_s22 = sshll.u32 %s2913_s5, 4  ;;  %s3058_s22 = int_to_ptr.vmem [resolvable:$true] %s588_s22 }
  0x15   : > { %s2811_s24 = scalar_lea.hbm %s3450_s14, 4096 }
  0x16   : > { %p3052_p5 = pnand %p3040_p2, %p2592_p4  ;;  %p2812_p6 = scmp.ne.s32.totalorder %s3450_s14, %s2811_s24 }
  0x17   : > { %p2818_p10 = scmp.lt.u32.totalorder %s2811_s24, %s3450_s14 }
  0x18   : > { %p3068_p7 = pneg %p3052_p5 }
  0x1a   : > { %p2814_p8 = pnand %p3068_p7, %p2812_p6 }
  0x1c   : > { %p2815_p9 = pneg %p2814_p8 }
  0x1e   : > { %p2820_p11 = pnand %p2818_p10, %p2815_p9 }
  0x20   : > { %2823 = shalt.err (!%p2820_p11)
}
  0x21   : > { %s2824_s23 = scalar_lea.vmem %s576_s29, 4096  ;;  %p2832_p1 = scmp.lt.s32.totalorder %s576_s29, %s576_s29 }
  0x22   : > { %p2825_p12 = scmp.ne.s32.totalorder %s576_s29, %s2824_s23  ;;  %p2833_p4 = scmp.lt.s32.totalorder %s2824_s23, %s2824_s23 }
  0x24   : > { %p2827_p13 = pnand %p2825_p12, %p3068_p7  ;;  %p2834_p2 = por %p2833_p4, %p2832_p1 }
  0x26   : > { %p2828_p0 = pneg %p2827_p13 }
  0x28   : > { %p2835_p3 = pnand %p2834_p2, %p2828_p0 }
  0x2a   : > { %2838 = shalt.err (!%p2835_p3)
}
  0x2b   : > { %s2914_s1 = smov 128   ;;  %s2915_s2 = smov 8  }
  0x2c   : > { %2598 = dma.hbm_to_vmem [thread:$0]  (!%p3052_p5), %s3450_s14, 4096, %s576_s29, [#allocation6], %s2914_s1, %s2914_s1, %s2915_s2  }
  0x2d   : > { %s3478_s27 = sld [smem:[#allocation14_spill]] }
  0x33   : > { %s2839_s21 = scalar_lea.hbm %s3478_s27, 4096 }
  0x34   : > { %p2840_p2 = scmp.ne.s32.totalorder %s3478_s27, %s2839_s21  ;;  %p2846_p8 = scmp.lt.u32.totalorder %s2839_s21, %s3478_s27 }
  0x36   : > { %p2842_p3 = pnand %p2840_p2, %p3068_p7 }
  0x38   : > { %p2843_p6 = pneg %p2842_p3 }
  0x3a   : > { %p2848_p9 = pnand %p2846_p8, %p2843_p6 }
  0x3c   : > { %2851 = shalt.err (!%p2848_p9)
}
  0x3d   : > { %s2852_s29 = scalar_lea.vmem %s3056_s4, 4096  ;;  %p2860_p13 = scmp.lt.s32.totalorder %s3056_s4, %s3056_s4 }
  0x3e   : > { %p2853_p10 = scmp.ne.s32.totalorder %s3056_s4, %s2852_s29  ;;  %p2861_p0 = scmp.lt.s32.totalorder %s2852_s29, %s2852_s29 }
  0x40   : > { %p2855_p11 = pnand %p2853_p10, %p3068_p7  ;;  %p2862_p1 = por %p2861_p0, %p2860_p13 }
  0x42   : > { %p2856_p12 = pneg %p2855_p11 }
  0x44   : > { %p2863_p4 = pnand %p2862_p1, %p2856_p12 }
  0x46   : > { %2866 = shalt.err (!%p2863_p4)
}
  0x47   : > { %2595 = dma.hbm_to_vmem [thread:$0]  (!%p3052_p5), %s3478_s27, 4096, %s3056_s4, [#allocation4], %s2914_s1, %s2914_s1, %s2915_s2  }
  0x48   : > { %s2867_s24 = scalar_lea.hbm %s3451_s15, 4096 }
  0x49   : > { %p2868_p2 = scmp.ne.s32.totalorder %s3451_s15, %s2867_s24  ;;  %p2874_p8 = scmp.lt.u32.totalorder %s2867_s24, %s3451_s15 }
  0x4b   : > { %p2870_p3 = pnand %p2868_p2, %p3068_p7 }
  0x4d   : > { %p2871_p6 = pneg %p2870_p3 }
  0x4f   : > { %p2876_p9 = pnand %p2874_p8, %p2871_p6 }
  0x51   : > { %2879 = shalt.err (!%p2876_p9)
}
  0x52   : > { %s2880_s4 = scalar_lea.vmem %s3058_s22, 4096  ;;  %p2888_p13 = scmp.lt.s32.totalorder %s3058_s22, %s3058_s22 }
  0x53   : > { %p2881_p10 = scmp.ne.s32.totalorder %s3058_s22, %s2880_s4  ;;  %p2889_p0 = scmp.lt.s32.totalorder %s2880_s4, %s2880_s4 }
  0x55   : > { %p2883_p11 = pnand %p2881_p10, %p3068_p7  ;;  %p2890_p1 = por %p2889_p0, %p2888_p13 }
  0x57   : > { %p2884_p12 = pneg %p2883_p11 }
  0x59   : > { %p2891_p4 = pnand %p2890_p1, %p2884_p12 }
  0x5b   : > { %2894 = shalt.err (!%p2891_p4)
}
  0x5c   : > { %2601 = dma.hbm_to_vmem [thread:$0]  (!%p3052_p5), %s3451_s15, 4096, %s3058_s22, [#allocation6], %s2914_s1, %s2914_s1, %s2915_s2  }
  0x5d   : > { %p3479_p2 = scmp.ne.s32.totalorder %s3475_s3, 0 }
  0x5e   : > { %p3480_p7 = scmp.ne.s32.totalorder (!%p3479_p2), %s3474_s20, 0 }
  0x5f   : > { %637 = sbr.rel (%p3479_p2) target bundleno = 1679 (0x68f), region = 104 }
  0x66   : > { %2900 = dma.done.wait (%p3480_p7), [#allocation4], 4096  }
  0x67   : > { %2902 = vsyncadd (%p3480_p7), [#allocation4], 4294963200 }
  0x68   : > { %2904 = dma.done.wait (%p3480_p7), [#allocation6], 8192  }
  0x69   : > { %2906 = vsyncadd (%p3480_p7), [#allocation6], 4294959104  ;;  %s3481_s30 = sadd.s32 4294967295, %s2909_s26   ;;  %v2916_v1 = vmov 0   ;;  %vm781_vm0 = vcmask 1045504   ;;  %s3482_s2 = sld [smem:[#allocation10_spill]]  ;;  %v756_v25 = vlaneseq }
  0x6a   : > { %s2411_s28 = sshll.u32 %s3481_s30, 2  ;;  %820 = vmatprep.mubr.bf16.mxu1 %v2916_v1  ;;  %s3483_s20 = sld [smem:[#allocation12_spill]]  ;;  %vm774_vm1 = vcmask 97280   ;;  %v2625_v11 = vld [vmem:[#allocation3] ss:$8 sps:$4 sm:$0xff]   ;;  %vm1369_vm2 = vcmask 1042432  }
  0x6b   : > { %p711_p5 = scmp.lt.s32.totalorder %s2411_s28, 7  ;;  %v2627_v12 = vld [vmem:[#allocation3 + $0x4] ss:$8 sps:$4 sm:$0xff]   ;;  %v2630_v13 = vld [vmem:[#allocation3 + $0x14] ss:$8 sps:$4 sm:$0xff]   ;;  %v757_v26 = vshrl.u32 %v756_v25, 7 }
  0x6c   : > { %v2628_v14 = vld [vmem:[#allocation3 + $0x10] ss:$8 sps:$4 sm:$0xff]   ;;  %v2633_v15 = vld [vmem:[#allocation3 + $0x24] ss:$8 sps:$4 sm:$0xff]   ;;  %v2631_v16 = vld [vmem:[#allocation3 + $0x20] ss:$8 sps:$4 sm:$0xff]  }
  0x6d   : > { %s3492_s28 = smov (!%p711_p5, %s2411_s28), 7  ;;  %v2636_v17 = vld [vmem:[#allocation3 + $0x34] ss:$8 sps:$4 sm:$0xff]   ;;  %v2634_v18 = vld [vmem:[#allocation3 + $0x30] ss:$8 sps:$4 sm:$0xff]   ;;  %v3165_v27 = vsub.s32 0, %v757_v26 }
  0x6e   : > { %s3152_s3 = sshll.u32 %s3492_s28, 3  ;;  %v2639_v19 = vld [vmem:[#allocation3 + $0x44] ss:$8 sps:$4 sm:$0xff]   ;;  %v2637_v20 = vld [vmem:[#allocation3 + $0x40] ss:$8 sps:$4 sm:$0xff]   ;;  %s3484_s23 = sld [smem:[#allocation13_spill]] }
  0x6f   : > { %s714_s18 = scalar_lea.vmem %s3482_s2, %s3152_s3  ;;  %v2642_v21 = vld [vmem:[#allocation3 + $0x54] ss:$8 sps:$4 sm:$0xff]   ;;  %v2640_v22 = vld [vmem:[#allocation3 + $0x50] ss:$8 sps:$4 sm:$0xff]   ;;  %v2645_v23 = vld [vmem:[#allocation3 + $0x64] ss:$8 sps:$4 sm:$0xff]  }
  0x70   : > { %v2622_v2 = vld [vmem:[%s3483_s20 + $0x4] ss:$8 sps:$4 sm:$0x3f]   ;;  %v2624_v3 = vld [vmem:[%s3483_s20] ss:$8 sps:$4 sm:$0x3f]  }
  0x71   : > { %v741_v4 = vld [vmem:[%s714_s18] sm:$0xff]  ;;  %v742_v5 = vld [vmem:[%s714_s18 + $0x8] sm:$0xff]  ;;  %2419 = vmatprep.subr.msk.bf16.mxu1 %vm781_vm0, %v2622_v2  ;;  %v783_v6 = vsel %vm781_vm0, %v2624_v3, 0  ;;  %v743_v8 = vld [vmem:[%s714_s18 + $0x10] sm:$0xff]  ;;  %v3170_v29 = vsub.s32 1, %v757_v26  ;;  %vm1362_vm3 = vcmask 48128  }
  0x72   : > { %v745_v7 = vpack.c.bf16 %v742_v5, %v741_v4  ;;  %789 = vmatpush1.bf16.msra.mxu1 %v783_v6  ;;  %v744_v9 = vld [vmem:[%s714_s18 + $0x18] sm:$0xff]  ;;  %v2643_v24 = vld [vmem:[#allocation3 + $0x60] ss:$8 sps:$4 sm:$0xff]   ;;  %v2651_v3 = vld [vmem:[#allocation3 + $0x84] ss:$8 sps:$4 sm:$0xff]   ;;  %s3485_s18 = sld [smem:[#allocation11_spill]] }
  0x73   : > { %v746_v10 = vpack.c.bf16 %v744_v9, %v743_v8  ;;  %1170 = vmatprep.subr.bf16.mxu1 %v2627_v12  ;;  %v2648_v0 = vld [vmem:[#allocation3 + $0x74] ss:$8 sps:$4 sm:$0xff]   ;;  %v2646_v2 = vld [vmem:[#allocation3 + $0x70] ss:$8 sps:$4 sm:$0xff]   ;;  %v2649_v4 = vld [vmem:[#allocation3 + $0x80] ss:$8 sps:$4 sm:$0xff]  }
  0x74   : > { %v729_v28 = vld [vmem:[%s3484_s23] sm:$0x3]  ;;  %v2652_v6 = vld [vmem:[#allocation3 + $0x90] ss:$8 sps:$4 sm:$0xff]   ;;  %s3486_s25 = sld [smem:[#allocation15_spill]]  ;;  %s3489_s23 = sld [smem:[#allocation18_spill]] }
  0x75   : > { %2420 = vmatmul.mubr.msk.bf16.vlgmr.msra.gmra.mrb[0].mxu1 %vm774_vm1, %v745_v7  ;;  %v759_v30 = vrot.slane %v729_v28, %v3165_v27  ;;  %v763_v31 = vrot.slane %v729_v28, %v3170_v29  ;;  %v2654_v5 = vld [vmem:[#allocation3 + $0x94] ss:$8 sps:$4 sm:$0xff]   ;;  %v2657_v7 = vld [vmem:[#allocation3 + $0xa4] ss:$8 sps:$4 sm:$0xff]   ;;  %v2655_v8 = vld [vmem:[#allocation3 + $0xa0] ss:$8 sps:$4 sm:$0xff]  }
  0x76   : > { %830 = vmatprep.mubr.bf16.mxu1 %v2916_v1  ;;  %1171 = vmatpush1.bf16.msra.mxu1 %v2625_v11  ;;  %v2660_v9 = vld [vmem:[#allocation3 + $0xb4] ss:$8 sps:$4 sm:$0xff]   ;;  %v2663_v11 = vld [vmem:[#allocation3 + $0xc4] ss:$8 sps:$4 sm:$0xff]   ;;  %v2661_v12 = vld [vmem:[#allocation3 + $0xc0] ss:$8 sps:$4 sm:$0xff]  }
  0x77   : > { %1172 = vmatprep.subr.bf16.mxu1 %v2630_v13  ;;  %v2666_v13 = vld [vmem:[#allocation3 + $0xd4] ss:$8 sps:$4 sm:$0xff]   ;;  %s3490_s13 = sld [smem:[#allocation19_spill]]  ;;  %vm2296_vm4 = vcmask 7168  }
  0x78   : > { %s720_s19 = scalar_lea.vmem %s3485_s18, %s3152_s3 }
  0x7a   : > { %1173 = vmatpush1.bf16.msra.mxu1 %v2628_v14  ;;  %v2664_v14 = vld [vmem:[#allocation3 + $0xd0] ss:$8 sps:$4 sm:$0xff]  }
  0x7b   : > { %1174 = vmatprep.subr.bf16.mxu1 %v2633_v15  ;;  %v2667_v15 = vld [vmem:[#allocation3 + $0xe0] ss:$8 sps:$4 sm:$0xff]  }
  0x7d   : > { %2421 = vmatmul.mubr.msk.bf16.gmra.mrb[4].mxu1 %vm774_vm1, %v746_v10  ;;  %v2658_v10 = vld [vmem:[#allocation3 + $0xb0] ss:$8 sps:$4 sm:$0xff]   ;;  %s726_s30 = scalar_lea.vmem %s3490_s13, %s3152_s3 }
  0x7e   : > { %1175 = vmatpush1.bf16.msra.mxu1 %v2631_v16  ;;  %v2669_v16 = vld [vmem:[#allocation3 + $0xe4] ss:$8 sps:$4 sm:$0xff]  }
  0x7f   : > { %1176 = vmatprep.subr.bf16.mxu1 %v2636_v17  ;;  %v2672_v17 = vld [vmem:[#allocation3 + $0xf4] ss:$8 sps:$4 sm:$0xff]  }
  0x82   : > { %1177 = vmatpush1.bf16.msra.mxu1 %v2634_v18  ;;  %v2670_v18 = vld [vmem:[#allocation3 + $0xf0] ss:$8 sps:$4 sm:$0xff]  }
  0x83   : > { %1178 = vmatprep.subr.bf16.mxu1 %v2639_v19  ;;  %v1345_v19 = vld [vmem:[%s3442_s6] sm:$0x77] }
  0x86   : > { %1179 = vmatpush1.bf16.msra.mxu1 %v2637_v20  ;;  %v2455_v20 = vcombine.high %v1345_v19, %v1345_v19 }
  0x87   : > { %1180 = vmatprep.subr.bf16.mxu1 %v2642_v21  ;;  %v2454_v21 = vcombine.low %v1345_v19, %v1345_v19 }
  0x8a   : > { %1181 = vmatpush1.bf16.msra.mxu1 %v2640_v22  ;;  %v3217_v22 = vsel %vm1369_vm2, %v2454_v21, 0 }
  0x8b   : > { %1182 = vmatprep.subr.bf16.mxu1 %v2645_v23 }
  0x8e   : > { %1183 = vmatpush1.bf16.msra.mxu1 %v2643_v24 }
  0x8f   : > { %1184 = vmatprep.subr.bf16.mxu1 %v2648_v0 }
  0x92   : > { %1185 = vmatpush1.bf16.msra.mxu1 %v2646_v2 }
  0x93   : > { %1186 = vmatprep.subr.bf16.mxu1 %v2651_v3 }
  0x96   : > { %1187 = vmatpush1.bf16.msra.mxu1 %v2649_v4 }
  0x97   : > { %1188 = vmatprep.subr.bf16.mxu1 %v2654_v5 }
  0x9a   : > { %1189 = vmatpush1.bf16.msra.mxu1 %v2652_v6  ;;  %v736_v6 = vld [vmem:[%s3445_s9] sm:$0x3] }
  0x9b   : > { %1190 = vmatprep.subr.bf16.mxu1 %v2657_v7 }
  0x9e   : > { %1191 = vmatpush1.bf16.msra.mxu1 %v2655_v8 }
  0x9f   : > { %1192 = vmatprep.subr.bf16.mxu1 %v2660_v9 }
  0xa2   : > { %1193 = vmatpush1.bf16.msra.mxu1 %v2658_v10 }
  0xa3   : > { %1194 = vmatprep.subr.bf16.mxu1 %v2663_v11  ;;  %v940_v11 = vrot.slane %v736_v6, %v3165_v27 }
  0xa6   : > { %1195 = vmatpush1.bf16.msra.mxu1 %v2661_v12 }
  0xa7   : > { %1196 = vmatprep.subr.bf16.mxu1 %v2666_v13 }
  0xaa   : > { %1197 = vmatpush1.bf16.msra.mxu1 %v2664_v14 }
  0xab   : > { %1198 = vmatprep.subr.bf16.mxu1 %v2669_v16 }
  0xae   : > { %1199 = vmatpush1.bf16.msra.mxu1 %v2667_v15 }
  0xaf   : > { %1200 = vmatprep.subr.bf16.mxu1 %v2672_v17 }
  0xb2   : > { %1201 = vmatpush1.bf16.msra.mxu1 %v2670_v18 }
  0xb3   : > { %2456 = vmatprep.subr.msk.bf16.mxu1 %vm1369_vm2, %v2455_v20 }
 0x148   : > { %v822_v32 = vpop.f32.mrb[0].mxu1 }
 0x149   : > { %v3174_v33 = vadd.f32 %v822_v32, %v759_v30  ;;  %v824_v34 = vpop.f32.mrb[1].mxu1 }
 0x14a   : > { %v3176_v35 = vadd.f32 %v824_v34, %v763_v31  ;;  %v826_v36 = vpop.f32.mrb[2].mxu1 }
 0x14b   : > { %v3178_v37 = vadd.f32 %v826_v36, %v759_v30  ;;  %v828_v38 = vpop.f32.mrb[3].mxu1  ;;  %v853_v39 = vmul.f32 %v3174_v33, %v3174_v33 }
 0x14c   : > { %v3182_v40 = vadd.f32 %v828_v38, %v763_v31  ;;  %v841_v41 = vadd.f32 %v3176_v35, %v3174_v33  ;;  %v854_v42 = vmul.f32 %v3176_v35, %v3176_v35 }
 0x14d   : > { %v855_v44 = vmul.f32 %v3178_v37, %v3178_v37 }
 0x14e   : > { %842 = vadd.xlane.f32.xlu0 %v841_v41  ;;  %v861_v43 = vadd.f32 %v854_v42, %v853_v39  ;;  %v856_v45 = vmul.f32 %v3182_v40, %v3182_v40  ;;  %v844_v47 = vadd.f32 %v3182_v40, %v3178_v37 }
 0x150   : > { %v832_v46 = vpop.f32.mrb[4].mxu1  ;;  %862 = vadd.xlane.f32.xlu1 %v861_v43  ;;  %v864_v52 = vadd.f32 %v856_v45, %v855_v44 }
 0x151   : > { %v3194_v48 = vadd.f32 %v832_v46, %v759_v30  ;;  %v834_v49 = vpop.f32.mrb[5].mxu1 }
 0x152   : > { %v3196_v50 = vadd.f32 %v834_v49, %v763_v31  ;;  %v836_v51 = vpop.f32.mrb[6].mxu1  ;;  %845 = vadd.xlane.f32.xlu0 %v844_v47 }
 0x153   : > { %v3198_v53 = vadd.f32 %v836_v51, %v759_v30  ;;  %v838_v54 = vpop.f32.mrb[7].mxu1  ;;  %v857_v57 = vmul.f32 %v3194_v48, %v3194_v48 }
 0x154   : > { %v3200_v55 = vadd.f32 %v838_v54, %v763_v31  ;;  %865 = vadd.xlane.f32.xlu1 %v864_v52  ;;  %v847_v56 = vadd.f32 %v3196_v50, %v3194_v48  ;;  %v858_v58 = vmul.f32 %v3196_v50, %v3196_v50 }
 0x155   : > { %v859_v60 = vmul.f32 %v3198_v53, %v3198_v53 }
 0x156   : > { %848 = vadd.xlane.f32.xlu0 %v847_v56  ;;  %v850_v59 = vadd.f32 %v3200_v55, %v3198_v53  ;;  %v860_v61 = vmul.f32 %v3200_v55, %v3200_v55  ;;  %v867_v62 = vadd.f32 %v858_v58, %v857_v57 }
 0x158   : > { %851 = vadd.xlane.f32.xlu1 %v850_v59  ;;  %v870_v63 = vadd.f32 %v860_v61, %v859_v60 }
 0x15a   : > { %868 = vadd.xlane.f32.xlu0 %v867_v62  ;;  %v735_v62 = vld [vmem:[%s3444_s8] sm:$0x3] }
 0x15b   : > { %v921_v7 = vrot.slane %v735_v62, %v3165_v27  ;;  %v925_v8 = vrot.slane %v735_v62, %v3170_v29  ;;  %v750_v62 = vld [vmem:[%s720_s19 + $0x18] sm:$0xff] }
 0x15c   : > { %871 = vadd.xlane.f32.xlu1 %v870_v63 }
 0x1db   : > { %v843_v23 = vpop.xlane.xlu0 %842 }
 0x1dc   : > { %v873_v24 = vmul.f32 0.00390625, %v843_v23 }
 0x1dd   : > { %v863_v25 = vpop.xlane.xlu1 %862 }
 0x1de   : > { %v877_v26 = vmul.f32 0.00390625, %v863_v25  ;;  %v881_v28 = vmul.f32 %v873_v24, %v873_v24  ;;  %v893_v2 = vsub.f32 %v3174_v33, %v873_v24  ;;  %v894_v3 = vsub.f32 %v3176_v35, %v873_v24 }
 0x1df   : > { %v846_v30 = vpop.xlane.xlu0 %845  ;;  %v944_v33 = vrot.slane %v736_v6, %v3170_v29  ;;  %v2683_v6 = vld [vmem:[#allocation7 + $0x20] ss:$8 sps:$4 sm:$0xff]  }
 0x1e0   : > { %v885_v31 = vsub.f32 %v877_v26, %v881_v28  ;;  %v874_v32 = vmul.f32 0.00390625, %v846_v30 }
 0x1e1   : > { %v866_v34 = vpop.xlane.xlu1 %865 }
 0x1e2   : > { %v889_v36 = vmax.f32 %v885_v31, 0.0  ;;  %v878_v38 = vmul.f32 0.00390625, %v866_v34  ;;  %v882_v39 = vmul.f32 %v874_v32, %v874_v32  ;;  %v895_v35 = vsub.f32 %v3178_v37, %v874_v32 }
 0x1e3   : > { %v849_v41 = vpop.xlane.xlu0 %848  ;;  %v896_v12 = vsub.f32 %v3182_v40, %v874_v32 }
 0x1e4   : > { %v901_v42 = vadd.f32 1e-05, %v889_v36  ;;  %v875_v43 = vmul.f32 0.00390625, %v849_v41  ;;  %v886_v44 = vsub.f32 %v878_v38, %v882_v39 }
 0x1e5   : > { %v852_v45 = vpop.xlane.xlu1 %851 }
 0x1e6   : > { %2787 = vrsqrt.f32 %v901_v42  ;;  %v876_v46 = vmul.f32 0.00390625, %v852_v45  ;;  %v890_v47 = vmax.f32 %v886_v44, 0.0  ;;  %v883_v51 = vmul.f32 %v875_v43, %v875_v43 }
 0x1e7   : > { %v869_v49 = vpop.xlane.xlu0 %868  ;;  %v897_v23 = vsub.f32 %v3194_v48, %v875_v43  ;;  %v898_v24 = vsub.f32 %v3196_v50, %v875_v43 }
 0x1e8   : > { %v879_v52 = vmul.f32 0.00390625, %v869_v49  ;;  %v902_v54 = vadd.f32 1e-05, %v890_v47  ;;  %v884_v58 = vmul.f32 %v876_v46, %v876_v46  ;;  %v899_v37 = vsub.f32 %v3198_v53, %v876_v46 }
 0x1e9   : > { %v872_v56 = vpop.xlane.xlu1 %871  ;;  %v900_v40 = vsub.f32 %v3200_v55, %v876_v46 }
 0x1ea   : > { %v887_v57 = vsub.f32 %v879_v52, %v883_v51  ;;  %v880_v59 = vmul.f32 0.00390625, %v872_v56  ;;  %2789 = vrsqrt.f32 %v902_v54 }
 0x1ec   : > { %v891_v60 = vmax.f32 %v887_v57, 0.0  ;;  %v888_v61 = vsub.f32 %v880_v59, %v884_v58  ;;  %v747_v59 = vld [vmem:[%s720_s19] sm:$0xff] }
 0x1ee   : > { %v903_v63 = vadd.f32 1e-05, %v891_v60  ;;  %v892_v0 = vmax.f32 %v888_v61, 0.0  ;;  %v748_v60 = vld [vmem:[%s720_s19 + $0x8] sm:$0xff] }
 0x1ef   : > { %v751_v61 = vpack.c.bf16 %v748_v60, %v747_v59  ;;  %v731_v60 = vld [vmem:[%s3443_s7] sm:$0x3] }
 0x1f0   : > { %v2788_v4 = vpop.eup %2787  ;;  %2791 = vrsqrt.f32 %v903_v63  ;;  %v904_v5 = vadd.f32 1e-05, %v892_v0  ;;  %v2675_v0 = vld [vmem:[#allocation7 + $0x4] ss:$8 sps:$4 sm:$0xff]  }
 0x1f1   : > { %v909_v9 = vmul.f32 %v2788_v4, %v893_v2  ;;  %v910_v10 = vmul.f32 %v2788_v4, %v894_v3  ;;  %v2677_v2 = vld [vmem:[#allocation7] ss:$8 sps:$4 sm:$0xff]   ;;  %v2678_v3 = vld [vmem:[#allocation7 + $0x14] ss:$8 sps:$4 sm:$0xff]   ;;  %1669 = vmatprep.subr.bf16.mxu0 %v2675_v0  ;;  %v2680_v4 = vld [vmem:[#allocation7 + $0x10] ss:$8 sps:$4 sm:$0xff]  }
 0x1f2   : > { %2793 = vrsqrt.f32 %v904_v5  ;;  %1670 = vmatpush1.bf16.msra.mxu0 %v2677_v2  ;;  %v2681_v5 = vld [vmem:[#allocation7 + $0x24] ss:$8 sps:$4 sm:$0xff]  }
 0x1f3   : > { %v929_v13 = vmul.f32 %v925_v8, %v910_v10  ;;  %v928_v14 = vmul.f32 %v921_v7, %v909_v9  ;;  %1671 = vmatprep.subr.bf16.mxu0 %v2678_v3  ;;  %v2689_v9 = vld [vmem:[#allocation7 + $0x40] ss:$8 sps:$4 sm:$0xff]   ;;  %v2690_v10 = vld [vmem:[#allocation7 + $0x54] ss:$8 sps:$4 sm:$0xff]   ;;  %v1350_v3 = vrot.slane %v731_v60, %v3165_v27 }
 0x1f4   : > { %v2790_v15 = vpop.eup %2789 }
 0x1f5   : > { %v911_v16 = vmul.f32 %v2790_v15, %v895_v35  ;;  %v912_v17 = vmul.f32 %v2790_v15, %v896_v12  ;;  %v948_v19 = vadd.f32 %v944_v33, %v929_v13  ;;  %v947_v21 = vadd.f32 %v940_v11, %v928_v14  ;;  %v2695_v35 = vld [vmem:[#allocation7 + $0x60] ss:$8 sps:$4 sm:$0xff]   ;;  %v2696_v12 = vld [vmem:[#allocation7 + $0x74] ss:$8 sps:$4 sm:$0xff]   ;;  %v2698_v13 = vld [vmem:[#allocation7 + $0x70] ss:$8 sps:$4 sm:$0xff]  }
 0x1f6   : > { %1672 = vmatpush1.bf16.msra.mxu0 %v2680_v4  ;;  %v2699_v14 = vld [vmem:[#allocation7 + $0x84] ss:$8 sps:$4 sm:$0xff]   ;;  %v2701_v15 = vld [vmem:[#allocation7 + $0x80] ss:$8 sps:$4 sm:$0xff]  }
 0x1f7   : > { %v931_v18 = vmul.f32 %v925_v8, %v912_v17  ;;  %v930_v20 = vmul.f32 %v921_v7, %v911_v16  ;;  %v956_v34 = vmax.f32 %v948_v19, 0.0  ;;  %v955_v38 = vmax.f32 %v947_v21, 0.0  ;;  %1673 = vmatprep.subr.bf16.mxu0 %v2681_v5  ;;  %v2702_v16 = vld [vmem:[#allocation7 + $0x94] ss:$8 sps:$4 sm:$0xff]   ;;  %v2704_v17 = vld [vmem:[#allocation7 + $0x90] ss:$8 sps:$4 sm:$0xff]  }
 0x1f8   : > { %v2707_v19 = vld [vmem:[#allocation7 + $0xa0] ss:$8 sps:$4 sm:$0xff]   ;;  %v2710_v21 = vld [vmem:[#allocation7 + $0xb0] ss:$8 sps:$4 sm:$0xff]  }
 0x1f9   : > { %v950_v26 = vadd.f32 %v944_v33, %v931_v18  ;;  %v949_v28 = vadd.f32 %v940_v11, %v930_v20  ;;  %v2705_v18 = vld [vmem:[#allocation7 + $0xa4] ss:$8 sps:$4 sm:$0xff]   ;;  %v2708_v20 = vld [vmem:[#allocation7 + $0xb4] ss:$8 sps:$4 sm:$0xff]  }
 0x1fa   : > { %v2792_v25 = vpop.eup %2791  ;;  %1674 = vmatpush1.bf16.msra.mxu0 %v2683_v6 }
 0x1fb   : > { %v914_v30 = vmul.f32 %v2792_v25, %v898_v24  ;;  %v913_v31 = vmul.f32 %v2792_v25, %v897_v23  ;;  %v958_v36 = vmax.f32 %v950_v26, 0.0  ;;  %v957_v39 = vmax.f32 %v949_v28, 0.0  ;;  %v2711_v23 = vld [vmem:[#allocation7 + $0xc4] ss:$8 sps:$4 sm:$0xff]   ;;  %v2713_v24 = vld [vmem:[#allocation7 + $0xc0] ss:$8 sps:$4 sm:$0xff]  }
 0x1fc   : > { %v2794_v32 = vpop.eup %2793  ;;  %v2714_v25 = vld [vmem:[#allocation7 + $0xd4] ss:$8 sps:$4 sm:$0xff]   ;;  %v2716_v26 = vld [vmem:[#allocation7 + $0xd0] ss:$8 sps:$4 sm:$0xff]   ;;  %v2717_v28 = vld [vmem:[#allocation7 + $0xe4] ss:$8 sps:$4 sm:$0xff]  }
 0x1fd   : > { %v916_v41 = vmul.f32 %v2794_v32, %v900_v40  ;;  %v933_v42 = vmul.f32 %v925_v8, %v914_v30  ;;  %v915_v44 = vmul.f32 %v2794_v32, %v899_v37  ;;  %v932_v48 = vmul.f32 %v921_v7, %v913_v31  ;;  %v2719_v37 = vld [vmem:[#allocation7 + $0xe0] ss:$8 sps:$4 sm:$0xff]   ;;  %v2720_v40 = vld [vmem:[#allocation7 + $0xf4] ss:$8 sps:$4 sm:$0xff]   ;;  %v2722_v30 = vld [vmem:[#allocation7 + $0xf0] ss:$8 sps:$4 sm:$0xff]  }
 0x1fe   : > { %v964_v45 = vpack.c.bf16 %v958_v36, %v956_v34  ;;  %v963_v50 = vpack.c.bf16 %v957_v39, %v955_v38  ;;  %v2725_v31 = vld [vmem:[#allocation5 + $0x4] ss:$8 sps:$4 sm:$0xff]   ;;  %v730_v32 = vld [vmem:[%s3486_s25] sm:$0x3]  ;;  %s3488_s25 = sld [smem:[#allocation17_spill]] }
 0x1ff   : > { %v935_v43 = vmul.f32 %v925_v8, %v916_v41  ;;  %v952_v47 = vadd.f32 %v944_v33, %v933_v42  ;;  %v934_v49 = vmul.f32 %v921_v7, %v915_v44  ;;  %v951_v53 = vadd.f32 %v940_v11, %v932_v48  ;;  %v2684_v7 = vld [vmem:[#allocation7 + $0x34] ss:$8 sps:$4 sm:$0xff]   ;;  %v2686_v8 = vld [vmem:[#allocation7 + $0x30] ss:$8 sps:$4 sm:$0xff]  }
 0x200   : > { %1202 = vmatprep.mubr.bf16.mxu1 %v964_v45  ;;  %1675 = vmatprep.subr.bf16.mxu0 %v2684_v7  ;;  %v1003_v34 = vrot.slane %v730_v32, %v3165_v27  ;;  %v1007_v36 = vrot.slane %v730_v32, %v3170_v29  ;;  %v1354_v7 = vrot.slane %v731_v60, %v3170_v29  ;;  %v2737_v32 = vld [vmem:[#allocation5 + $0x44] ss:$8 sps:$4 sm:$0xff]   ;;  %v2744_v60 = vld [vmem:[#allocation5 + $0x70] ss:$8 sps:$4 sm:$0xff]  }
 0x201   : > { %1203 = vmatmul.mubr.bf16.vlgmr.msra.gmra.mrb[8].mxu1 %v963_v50  ;;  %v954_v55 = vadd.f32 %v944_v33, %v935_v43  ;;  %v953_v46 = vadd.f32 %v940_v11, %v934_v49  ;;  %v960_v51 = vmax.f32 %v952_v47, 0.0  ;;  %v959_v54 = vmax.f32 %v951_v53, 0.0  ;;  %1676 = vmatpush1.bf16.msra.mxu0 %v2686_v8  ;;  %v2692_v11 = vld [vmem:[#allocation7 + $0x50] ss:$8 sps:$4 sm:$0xff]   ;;  %v2693_v33 = vld [vmem:[#allocation7 + $0x64] ss:$8 sps:$4 sm:$0xff]  }
 0x202   : > { %1377 = vmatpush1.bf16.msra.mxu1 %v3217_v22  ;;  %v749_v22 = vld [vmem:[%s720_s19 + $0x10] sm:$0xff]  ;;  %s3487_s19 = sld [smem:[#allocation16_spill]] }
 0x203   : > { %v962_v52 = vmax.f32 %v954_v55, 0.0  ;;  %v961_v56 = vmax.f32 %v953_v46, 0.0  ;;  %v752_v63 = vpack.c.bf16 %v750_v62, %v749_v22 }
 0x205   : > { %v966_v57 = vpack.c.bf16 %v962_v52, %v960_v51  ;;  %v965_v58 = vpack.c.bf16 %v961_v56, %v959_v54 }
 0x207   : > { %1212 = vmatprep.mubr.bf16.mxu1 %v966_v57 }
 0x209   : > { %1213 = vmatmul.mubr.bf16.gmra.mrb[12].mxu1 %v965_v58 }
 0x20a   : > { %1408 = vmatprep.mubr.bf16.mxu1 %v2916_v1 }
 0x211   : > { %2457 = vmatmul.mubr.msk.bf16.vlgmr.msra.gmra.mrb[16].mxu1 %vm1362_vm3, %v751_v61 }
 0x212   : > { %1418 = vmatprep.mubr.bf16.mxu1 %v2916_v1  ;;  %v2687_v1 = vld [vmem:[#allocation7 + $0x44] ss:$8 sps:$4 sm:$0xff]  }
 0x213   : > { %1677 = vmatprep.subr.bf16.mxu0 %v2687_v1 }
 0x214   : > { %1678 = vmatpush1.bf16.msra.mxu0 %v2689_v9 }
 0x215   : > { %1679 = vmatprep.subr.bf16.mxu0 %v2690_v10 }
 0x218   : > { %1680 = vmatpush1.bf16.msra.mxu0 %v2692_v11 }
 0x219   : > { %2458 = vmatmul.mubr.msk.bf16.gmra.mrb[20].mxu1 %vm1362_vm3, %v752_v63  ;;  %1681 = vmatprep.subr.bf16.mxu0 %v2693_v33 }
 0x21c   : > { %1682 = vmatpush1.bf16.msra.mxu0 %v2695_v35 }
 0x21d   : > { %1683 = vmatprep.subr.bf16.mxu0 %v2696_v12 }
 0x220   : > { %1684 = vmatpush1.bf16.msra.mxu0 %v2698_v13 }
 0x221   : > { %1685 = vmatprep.subr.bf16.mxu0 %v2699_v14 }
 0x224   : > { %1686 = vmatpush1.bf16.msra.mxu0 %v2701_v15 }
 0x225   : > { %1687 = vmatprep.subr.bf16.mxu0 %v2702_v16 }
 0x228   : > { %1688 = vmatpush1.bf16.msra.mxu0 %v2704_v17 }
 0x229   : > { %1689 = vmatprep.subr.bf16.mxu0 %v2705_v18 }
 0x22c   : > { %1690 = vmatpush1.bf16.msra.mxu0 %v2707_v19 }
 0x22d   : > { %1691 = vmatprep.subr.bf16.mxu0 %v2708_v20 }
 0x230   : > { %1692 = vmatpush1.bf16.msra.mxu0 %v2710_v21  ;;  %v2723_v21 = vld [vmem:[#allocation5] ss:$8 sps:$4 sm:$0xff]  }
 0x231   : > { %1693 = vmatprep.subr.bf16.mxu0 %v2711_v23  ;;  %v2728_v23 = vld [vmem:[#allocation5 + $0x14] ss:$8 sps:$4 sm:$0xff]  }
 0x234   : > { %1694 = vmatpush1.bf16.msra.mxu0 %v2713_v24  ;;  %v2726_v24 = vld [vmem:[#allocation5 + $0x10] ss:$8 sps:$4 sm:$0xff]  }
 0x235   : > { %1695 = vmatprep.subr.bf16.mxu0 %v2714_v25  ;;  %v2731_v25 = vld [vmem:[#allocation5 + $0x24] ss:$8 sps:$4 sm:$0xff]  }
 0x238   : > { %1696 = vmatpush1.bf16.msra.mxu0 %v2716_v26  ;;  %v2729_v26 = vld [vmem:[#allocation5 + $0x20] ss:$8 sps:$4 sm:$0xff]  }
 0x239   : > { %1697 = vmatprep.subr.bf16.mxu0 %v2717_v28  ;;  %v2734_v28 = vld [vmem:[#allocation5 + $0x34] ss:$8 sps:$4 sm:$0xff]  }
 0x23c   : > { %1698 = vmatpush1.bf16.msra.mxu0 %v2719_v37 }
 0x23d   : > { %1699 = vmatprep.subr.bf16.mxu0 %v2720_v40 }
 0x240   : > { %1700 = vmatpush1.bf16.msra.mxu0 %v2722_v30  ;;  %v2732_v30 = vld [vmem:[#allocation5 + $0x30] ss:$8 sps:$4 sm:$0xff]  }
 0x241   : > { %1882 = vmatprep.subr.bf16.mxu0 %v2725_v31 }
 0x2d4   : > { %v1204_v38 = vpop.f32.mrb[8].mxu1 }
 0x2d5   : > { %v3249_v39 = vadd.f32 %v1204_v38, %v1003_v34  ;;  %v1206_v41 = vpop.f32.mrb[9].mxu1 }
 0x2d6   : > { %v3251_v42 = vadd.f32 %v1206_v41, %v1007_v36  ;;  %v1208_v44 = vpop.f32.mrb[10].mxu1 }
 0x2d7   : > { %v3253_v48 = vadd.f32 %v1208_v44, %v1003_v34  ;;  %v1210_v45 = vpop.f32.mrb[11].mxu1  ;;  %v1235_v47 = vmul.f32 %v3249_v39, %v3249_v39 }
 0x2d8   : > { %v3255_v50 = vadd.f32 %v1210_v45, %v1007_v36  ;;  %v1223_v43 = vadd.f32 %v3251_v42, %v3249_v39  ;;  %v1236_v49 = vmul.f32 %v3251_v42, %v3251_v42  ;;  %v2735_v45 = vld [vmem:[#allocation5 + $0x40] ss:$8 sps:$4 sm:$0xff]  }
 0x2d9   : > { %v1237_v55 = vmul.f32 %v3253_v48, %v3253_v48 }
 0x2da   : > { %1224 = vadd.xlane.f32.xlu0 %v1223_v43  ;;  %v1226_v53 = vadd.f32 %v3255_v50, %v3253_v48  ;;  %v1238_v46 = vmul.f32 %v3255_v50, %v3255_v50  ;;  %v1243_v52 = vadd.f32 %v1236_v49, %v1235_v47  ;;  %v2740_v49 = vld [vmem:[#allocation5 + $0x54] ss:$8 sps:$4 sm:$0xff]  }
 0x2dc   : > { %1227 = vadd.xlane.f32.xlu1 %v1226_v53  ;;  %v1214_v51 = vpop.f32.mrb[12].mxu1  ;;  %v1246_v59 = vadd.f32 %v1238_v46, %v1237_v55 }
 0x2dd   : > { %v3269_v54 = vadd.f32 %v1214_v51, %v1003_v34  ;;  %v1216_v56 = vpop.f32.mrb[13].mxu1 }
 0x2de   : > { %v3271_v57 = vadd.f32 %v1216_v56, %v1007_v36  ;;  %1244 = vadd.xlane.f32.xlu0 %v1243_v52  ;;  %v1218_v58 = vpop.f32.mrb[14].mxu1  ;;  %v2738_v52 = vld [vmem:[#allocation5 + $0x50] ss:$8 sps:$4 sm:$0xff]   ;;  %v2743_v56 = vld [vmem:[#allocation5 + $0x64] ss:$8 sps:$4 sm:$0xff]  }
 0x2df   : > { %v3276_v61 = vadd.f32 %v1218_v58, %v1003_v34  ;;  %v1220_v22 = vpop.f32.mrb[15].mxu1  ;;  %v1239_v0 = vmul.f32 %v3269_v54, %v3269_v54  ;;  %v2741_v58 = vld [vmem:[#allocation5 + $0x60] ss:$8 sps:$4 sm:$0xff]  }
 0x2e0   : > { %v3278_v62 = vadd.f32 %v1220_v22, %v1007_v36  ;;  %1247 = vadd.xlane.f32.xlu1 %v1246_v59  ;;  %v1229_v63 = vadd.f32 %v3271_v57, %v3269_v54  ;;  %v1240_v2 = vmul.f32 %v3271_v57, %v3271_v57  ;;  %v2746_v59 = vld [vmem:[#allocation5 + $0x74] ss:$8 sps:$4 sm:$0xff]   ;;  %v2749_v22 = vld [vmem:[#allocation5 + $0x84] ss:$8 sps:$4 sm:$0xff]  }
 0x2e1   : > { %v1241_v5 = vmul.f32 %v3276_v61, %v3276_v61 }
 0x2e2   : > { %1230 = vadd.xlane.f32.xlu0 %v1229_v63  ;;  %v1232_v4 = vadd.f32 %v3278_v62, %v3276_v61  ;;  %v1242_v6 = vmul.f32 %v3278_v62, %v3278_v62  ;;  %v1249_v8 = vadd.f32 %v1240_v2, %v1239_v0  ;;  %v2747_v63 = vld [vmem:[#allocation5 + $0x80] ss:$8 sps:$4 sm:$0xff]   ;;  %v2752_v0 = vld [vmem:[#allocation5 + $0x94] ss:$8 sps:$4 sm:$0xff]   ;;  %v2750_v2 = vld [vmem:[#allocation5 + $0x90] ss:$8 sps:$4 sm:$0xff]  }
 0x2e4   : > { %1233 = vadd.xlane.f32.xlu1 %v1232_v4  ;;  %v1410_v1 = vpop.f32.mrb[16].mxu1  ;;  %v1252_v11 = vadd.f32 %v1242_v6, %v1241_v5  ;;  %v2753_v4 = vld [vmem:[#allocation5 + $0xa0] ss:$8 sps:$4 sm:$0xff]   ;;  %v2758_v5 = vld [vmem:[#allocation5 + $0xb4] ss:$8 sps:$4 sm:$0xff]  }
 0x2e5   : > { %v1411_v9 = vadd.f32 %v1410_v1, %v1350_v3  ;;  %v1412_v10 = vpop.f32.mrb[17].mxu1  ;;  %v2756_v6 = vld [vmem:[#allocation5 + $0xb0] ss:$8 sps:$4 sm:$0xff]   ;;  %v2764_v1 = vld [vmem:[#allocation5 + $0xd4] ss:$8 sps:$4 sm:$0xff]  }
 0x2e6   : > { %1250 = vadd.xlane.f32.xlu0 %v1249_v8  ;;  %v1413_v33 = vadd.f32 %v1412_v10, %v1354_v7  ;;  %v1414_v35 = vpop.f32.mrb[18].mxu1  ;;  %v2759_v8 = vld [vmem:[#allocation5 + $0xc0] ss:$8 sps:$4 sm:$0xff]   ;;  %v2767_v10 = vld [vmem:[#allocation5 + $0xe4] ss:$8 sps:$4 sm:$0xff]  }
 0x2e7   : > { %v1429_v12 = vmax.f32 %v1411_v9, 0.0  ;;  %v1415_v13 = vadd.f32 %v1414_v35, %v1350_v3  ;;  %v1416_v14 = vpop.f32.mrb[19].mxu1  ;;  %v2762_v9 = vld [vmem:[#allocation5 + $0xd0] ss:$8 sps:$4 sm:$0xff]  }
 0x2e8   : > { %1253 = vadd.xlane.f32.xlu1 %v1252_v11  ;;  %v1430_v15 = vmax.f32 %v1413_v33, 0.0  ;;  %v1417_v16 = vadd.f32 %v1416_v14, %v1354_v7  ;;  %v2765_v11 = vld [vmem:[#allocation5 + $0xe0] ss:$8 sps:$4 sm:$0xff]   ;;  %v2770_v33 = vld [vmem:[#allocation5 + $0xf4] ss:$8 sps:$4 sm:$0xff]  }
 0x2e9   : > { %v1431_v17 = vmax.f32 %v1415_v13, 0.0  ;;  %v2768_v35 = vld [vmem:[#allocation5 + $0xf0] ss:$8 sps:$4 sm:$0xff]  }
 0x2ea   : > { %v1432_v18 = vmax.f32 %v1417_v16, 0.0 }
 0x2eb   : > { %v1473_v19 = vpack.c.bf16 %v1431_v17, %v1429_v12 }
 0x2ec   : > { %v1474_v20 = vpack.c.bf16 %v1432_v18, %v1430_v15  ;;  %v1420_v37 = vpop.f32.mrb[20].mxu1 }
 0x2ed   : > { %v1422_v40 = vpop.f32.mrb[21].mxu1  ;;  %v1421_v41 = vadd.f32 %v1420_v37, %v1350_v3 }
 0x2ee   : > { %1701 = vmatprep.mubr.bf16.mxu0 %v1474_v20  ;;  %v1424_v31 = vpop.f32.mrb[22].mxu1  ;;  %v1423_v36 = vadd.f32 %v1422_v40, %v1354_v7 }
 0x2ef   : > { %1702 = vmatmul.mubr.bf16.vlgmr.msra.gmra.mrb[0].mxu0 %v1473_v19  ;;  %v1426_v34 = vpop.f32.mrb[23].mxu1  ;;  %v1425_v44 = vadd.f32 %v1424_v31, %v1350_v3  ;;  %v1433_v53 = vmax.f32 %v1421_v41, 0.0  ;;  %v2755_v3 = vld [vmem:[#allocation5 + $0xa4] ss:$8 sps:$4 sm:$0xff]  }
 0x2f0   : > { %1883 = vmatpush1.bf16.msra.mxu0 %v2723_v21  ;;  %v1427_v38 = vadd.f32 %v1426_v34, %v1354_v7  ;;  %v1434_v43 = vmax.f32 %v1423_v36, 0.0  ;;  %v2761_v7 = vld [vmem:[#allocation5 + $0xc4] ss:$8 sps:$4 sm:$0xff]  }
 0x2f1   : > { %1884 = vmatprep.subr.bf16.mxu0 %v2728_v23  ;;  %v1435_v55 = vmax.f32 %v1425_v44, 0.0 }
 0x2f2   : > { %v1436_v47 = vmax.f32 %v1427_v38, 0.0 }
 0x2f3   : > { %v1475_v51 = vpack.c.bf16 %v1435_v55, %v1433_v53 }
 0x2f4   : > { %1885 = vmatpush1.bf16.msra.mxu0 %v2726_v24  ;;  %v1476_v46 = vpack.c.bf16 %v1436_v47, %v1434_v43 }
 0x2f5   : > { %1886 = vmatprep.subr.bf16.mxu0 %v2731_v25 }
 0x2f6   : > { %1711 = vmatprep.mubr.bf16.mxu0 %v1476_v46  ;;  %v737_v46 = vld [vmem:[%s3446_s10] sm:$0x3] }
 0x2f7   : > { %1712 = vmatmul.mubr.bf16.gmra.mrb[4].mxu0 %v1475_v51  ;;  %v738_v51 = vld [vmem:[%s3447_s11] sm:$0x3] }
 0x2f8   : > { %1887 = vmatpush1.bf16.msra.mxu0 %v2729_v26 }
 0x2f9   : > { %1888 = vmatprep.subr.bf16.mxu0 %v2734_v28 }
 0x2fc   : > { %1889 = vmatpush1.bf16.msra.mxu0 %v2732_v30 }
 0x2fd   : > { %1890 = vmatprep.subr.bf16.mxu0 %v2737_v32 }
 0x300   : > { %1891 = vmatpush1.bf16.msra.mxu0 %v2735_v45 }
 0x301   : > { %1892 = vmatprep.subr.bf16.mxu0 %v2740_v49 }
 0x304   : > { %1893 = vmatpush1.bf16.msra.mxu0 %v2738_v52 }
 0x305   : > { %1894 = vmatprep.subr.bf16.mxu0 %v2743_v56 }
 0x308   : > { %1895 = vmatpush1.bf16.msra.mxu0 %v2741_v58 }
 0x309   : > { %1896 = vmatprep.subr.bf16.mxu0 %v2746_v59  ;;  %v1303_v59 = vrot.slane %v737_v46, %v3165_v27 }
 0x30c   : > { %1897 = vmatpush1.bf16.msra.mxu0 %v2744_v60  ;;  %v1307_v60 = vrot.slane %v737_v46, %v3170_v29 }
 0x30d   : > { %1898 = vmatprep.subr.bf16.mxu0 %v2749_v22 }
 0x310   : > { %1899 = vmatpush1.bf16.msra.mxu0 %v2747_v63  ;;  %v1322_v63 = vrot.slane %v738_v51, %v3165_v27 }
 0x311   : > { %1900 = vmatprep.subr.bf16.mxu0 %v2752_v0  ;;  %v1326_v0 = vrot.slane %v738_v51, %v3170_v29 }
 0x314   : > { %1901 = vmatpush1.bf16.msra.mxu0 %v2750_v2 }
 0x315   : > { %1902 = vmatprep.subr.bf16.mxu0 %v2755_v3 }
 0x318   : > { %1903 = vmatpush1.bf16.msra.mxu0 %v2753_v4 }
 0x319   : > { %1904 = vmatprep.subr.bf16.mxu0 %v2758_v5 }
 0x31c   : > { %1905 = vmatpush1.bf16.msra.mxu0 %v2756_v6 }
 0x31d   : > { %1906 = vmatprep.subr.bf16.mxu0 %v2761_v7 }
 0x320   : > { %1907 = vmatpush1.bf16.msra.mxu0 %v2759_v8 }
 0x321   : > { %1908 = vmatprep.subr.bf16.mxu0 %v2764_v1 }
 0x324   : > { %1909 = vmatpush1.bf16.msra.mxu0 %v2762_v9 }
 0x325   : > { %1910 = vmatprep.subr.bf16.mxu0 %v2767_v10 }
 0x328   : > { %1911 = vmatpush1.bf16.msra.mxu0 %v2765_v11 }
 0x329   : > { %1912 = vmatprep.subr.bf16.mxu0 %v2770_v33 }
 0x32c   : > { %1913 = vmatpush1.bf16.msra.mxu0 %v2768_v35 }
 0x367   : > { %v1225_v12 = vpop.xlane.xlu0 %1224 }
 0x368   : > { %v1255_v13 = vmul.f32 0.00390625, %v1225_v12 }
 0x369   : > { %v1228_v14 = vpop.xlane.xlu1 %1227 }
 0x36a   : > { %v1256_v15 = vmul.f32 0.00390625, %v1228_v14  ;;  %v1263_v17 = vmul.f32 %v1255_v13, %v1255_v13  ;;  %v1275_v56 = vsub.f32 %v3249_v39, %v1255_v13  ;;  %v1276_v58 = vsub.f32 %v3251_v42, %v1255_v13 }
 0x36b   : > { %v1245_v16 = vpop.xlane.xlu0 %1244 }
 0x36c   : > { %v1259_v18 = vmul.f32 0.00390625, %v1245_v16  ;;  %v1264_v21 = vmul.f32 %v1256_v15, %v1256_v15  ;;  %v1277_v2 = vsub.f32 %v3253_v48, %v1256_v15  ;;  %v1278_v3 = vsub.f32 %v3255_v50, %v1256_v15 }
 0x36d   : > { %v1248_v19 = vpop.xlane.xlu1 %1247 }
 0x36e   : > { %v1267_v20 = vsub.f32 %v1259_v18, %v1263_v17  ;;  %v1260_v23 = vmul.f32 0.00390625, %v1248_v19 }
 0x36f   : > { %v1231_v24 = vpop.xlane.xlu0 %1230 }
 0x370   : > { %v1271_v25 = vmax.f32 %v1267_v20, 0.0  ;;  %v1268_v26 = vsub.f32 %v1260_v23, %v1264_v21  ;;  %v1257_v28 = vmul.f32 0.00390625, %v1231_v24 }
 0x371   : > { %v1234_v37 = vpop.xlane.xlu1 %1233 }
 0x372   : > { %v1283_v40 = vadd.f32 1e-05, %v1271_v25  ;;  %v1272_v30 = vmax.f32 %v1268_v26, 0.0  ;;  %v1258_v31 = vmul.f32 0.00390625, %v1234_v37  ;;  %v1265_v36 = vmul.f32 %v1257_v28, %v1257_v28 }
 0x373   : > { %v1251_v32 = vpop.xlane.xlu0 %1250  ;;  %v1279_v33 = vsub.f32 %v3269_v54, %v1257_v28  ;;  %v1280_v35 = vsub.f32 %v3271_v57, %v1257_v28 }
 0x374   : > { %2795 = vrsqrt.f32 %v1283_v40  ;;  %v1284_v34 = vadd.f32 1e-05, %v1272_v30  ;;  %v1261_v38 = vmul.f32 0.00390625, %v1251_v32  ;;  %v1266_v45 = vmul.f32 %v1258_v31, %v1258_v31 }
 0x375   : > { %v1254_v41 = vpop.xlane.xlu1 %1253  ;;  %v1282_v50 = vsub.f32 %v3278_v62, %v1258_v31  ;;  %v1281_v21 = vsub.f32 %v3276_v61, %v1258_v31  ;;  %v732_v31 = vld [vmem:[%s3452_s16] sm:$0x3] }
 0x376   : > { %2797 = vrsqrt.f32 %v1284_v34  ;;  %v1269_v44 = vsub.f32 %v1261_v38, %v1265_v36  ;;  %v1262_v43 = vmul.f32 0.00390625, %v1254_v41 }
 0x378   : > { %v1273_v47 = vmax.f32 %v1269_v44, 0.0  ;;  %v1270_v49 = vsub.f32 %v1262_v43, %v1266_v45  ;;  %v1939_v45 = vrot.slane %v732_v31, %v3165_v27  ;;  %v1943_v43 = vrot.slane %v732_v31, %v3170_v29 }
 0x37a   : > { %v1285_v53 = vadd.f32 1e-05, %v1273_v47  ;;  %v1274_v55 = vmax.f32 %v1270_v49, 0.0 }
 0x37c   : > { %2799 = vrsqrt.f32 %v1285_v53  ;;  %v1286_v52 = vadd.f32 1e-05, %v1274_v55 }
 0x37e   : > { %v2796_v22 = vpop.eup %2795  ;;  %2801 = vrsqrt.f32 %v1286_v52 }
 0x37f   : > { %v1291_v4 = vmul.f32 %v2796_v22, %v1275_v56  ;;  %v1292_v5 = vmul.f32 %v2796_v22, %v1276_v58 }
 0x380   : > { %v2798_v6 = vpop.eup %2797 }
 0x381   : > { %v1293_v39 = vmul.f32 %v2798_v6, %v1277_v2  ;;  %v1294_v7 = vmul.f32 %v2798_v6, %v1278_v3  ;;  %v1311_v42 = vmul.f32 %v1307_v60, %v1292_v5  ;;  %v1310_v8 = vmul.f32 %v1303_v59, %v1291_v4 }
 0x383   : > { %v1313_v1 = vmul.f32 %v1307_v60, %v1294_v7  ;;  %v1330_v9 = vadd.f32 %v1326_v0, %v1311_v42  ;;  %v1312_v10 = vmul.f32 %v1303_v59, %v1293_v39  ;;  %v1329_v11 = vadd.f32 %v1322_v63, %v1310_v8 }
 0x385   : > { %v1332_v12 = vadd.f32 %v1326_v0, %v1313_v1  ;;  %v1331_v13 = vadd.f32 %v1322_v63, %v1312_v10  ;;  %v1338_v14 = vmax.f32 %v1330_v9, 0.0  ;;  %v1337_v15 = vmax.f32 %v1329_v11, 0.0 }
 0x386   : > { %v2800_v48 = vpop.eup %2799 }
 0x387   : > { %v1340_v16 = vmax.f32 %v1332_v12, 0.0  ;;  %v1339_v17 = vmax.f32 %v1331_v13, 0.0  ;;  %v1296_v18 = vmul.f32 %v2800_v48, %v1280_v35  ;;  %v1295_v19 = vmul.f32 %v2800_v48, %v1279_v33 }
 0x388   : > { %v2802_v20 = vpop.eup %2801 }
 0x389   : > { %v1438_v23 = vpack.c.bf16 %v1340_v16, %v1338_v14  ;;  %v1437_v24 = vpack.c.bf16 %v1339_v17, %v1337_v15  ;;  %v1298_v25 = vmul.f32 %v2802_v20, %v1282_v50  ;;  %v1315_v54 = vmul.f32 %v1307_v60, %v1296_v18  ;;  %v2771_v50 = vld [vmem:[%s3453_s17 + $0x40] sm:$0xff]   ;;  %v2773_v15 = vld [vmem:[%s3453_s17 + $0x48] sm:$0xff]   ;;  %v2775_v17 = vld [vmem:[%s3453_s17 + $0x50] sm:$0xff]  }
 0x38a   : > { %v1297_v26 = vmul.f32 %v2802_v20, %v1281_v21  ;;  %v1314_v57 = vmul.f32 %v1303_v59, %v1295_v19  ;;  %v2772_v14 = vld [vmem:[%s3453_s17] sm:$0xff]   ;;  %2544 = vmatprep.subr.bf16.mxu1 %v2771_v50  ;;  %v2774_v16 = vld [vmem:[%s3453_s17 + $0x8] sm:$0xff]   ;;  %v2776_v18 = vld [vmem:[%s3453_s17 + $0x10] sm:$0xff]  }
 0x38b   : > { %1914 = vmatprep.mubr.bf16.mxu0 %v1438_v23  ;;  %v1317_v28 = vmul.f32 %v1307_v60, %v1298_v25  ;;  %v1334_v37 = vadd.f32 %v1326_v0, %v1315_v54  ;;  %2545 = vmatpush3.bf16.msra.mxu1 %v2772_v14  ;;  %v2777_v19 = vld [vmem:[%s3453_s17 + $0x58] sm:$0xff]   ;;  %v2779_v21 = vld [vmem:[%s3453_s17 + $0x60] sm:$0xff]   ;;  %v2782_v25 = vld [vmem:[%s3453_s17 + $0x28] sm:$0xff]  }
 0x38c   : > { %1915 = vmatmul.mubr.bf16.vlgmr.msra.gmra.mrb[0].mxu0 %v1437_v24  ;;  %v1316_v62 = vmul.f32 %v1303_v59, %v1297_v26  ;;  %v1333_v40 = vadd.f32 %v1322_v63, %v1314_v57  ;;  %2546 = vmatprep.subr.bf16.mxu1 %v2773_v15  ;;  %v2778_v20 = vld [vmem:[%s3453_s17 + $0x18] sm:$0xff]   ;;  %v2780_v23 = vld [vmem:[%s3453_s17 + $0x20] sm:$0xff]   ;;  %v2781_v24 = vld [vmem:[%s3453_s17 + $0x68] sm:$0xff]  }
 0x38d   : > { %v1336_v30 = vadd.f32 %v1326_v0, %v1317_v28  ;;  %v1342_v34 = vmax.f32 %v1334_v37, 0.0  ;;  %v2783_v54 = vld [vmem:[%s3453_s17 + $0x70] sm:$0xff]   ;;  %v2785_v57 = vld [vmem:[%s3453_s17 + $0x78] sm:$0xff]  }
 0x38e   : > { %v1335_v32 = vadd.f32 %v1322_v63, %v1316_v62  ;;  %v1341_v38 = vmax.f32 %v1333_v40, 0.0  ;;  %v2784_v26 = vld [vmem:[%s3453_s17 + $0x30] sm:$0xff]   ;;  %v2786_v28 = vld [vmem:[%s3453_s17 + $0x38] sm:$0xff]  }
 0x38f   : > { %v1344_v36 = vmax.f32 %v1336_v30, 0.0  ;;  %2547 = vmatpush3.bf16.msra.mxu1 %v2774_v16 }
 0x390   : > { %v1343_v41 = vmax.f32 %v1335_v32, 0.0  ;;  %2548 = vmatprep.subr.bf16.mxu1 %v2775_v17 }
 0x391   : > { %v1440_v44 = vpack.c.bf16 %v1344_v36, %v1342_v34 }
 0x392   : > { %v1439_v61 = vpack.c.bf16 %v1343_v41, %v1341_v38 }
 0x393   : > { %1924 = vmatprep.mubr.bf16.mxu0 %v1440_v44  ;;  %2549 = vmatpush3.bf16.msra.mxu1 %v2776_v18 }
 0x394   : > { %1925 = vmatmul.mubr.bf16.gmra.mrb[4].mxu0 %v1439_v61  ;;  %2550 = vmatprep.subr.bf16.mxu1 %v2777_v19 }
 0x397   : > { %2551 = vmatpush3.bf16.msra.mxu1 %v2778_v20 }
 0x398   : > { %2552 = vmatprep.subr.bf16.mxu1 %v2779_v21 }
 0x39b   : > { %2553 = vmatpush3.bf16.msra.mxu1 %v2780_v23 }
 0x39c   : > { %2554 = vmatprep.subr.bf16.mxu1 %v2781_v24 }
 0x39f   : > { %2555 = vmatpush3.bf16.msra.mxu1 %v2782_v25 }
 0x3a0   : > { %2556 = vmatprep.subr.bf16.mxu1 %v2783_v54 }
 0x3a3   : > { %2557 = vmatpush3.bf16.msra.mxu1 %v2784_v26 }
 0x3a4   : > { %2558 = vmatprep.subr.bf16.mxu1 %v2785_v57 }
 0x3a7   : > { %2559 = vmatpush3.bf16.msra.mxu1 %v2786_v28 }
 0x45f   : > { %v1916_v47 = vpop.f32.mrb[0].mxu0 }
 0x460   : > { %v3317_v49 = vadd.f32 %v1939_v45, %v1916_v47  ;;  %v1918_v53 = vpop.f32.mrb[1].mxu0 }
 0x461   : > { %v3319_v55 = vadd.f32 %v1943_v43, %v1918_v53  ;;  %v1920_v46 = vpop.f32.mrb[2].mxu0 }
 0x462   : > { %v3321_v51 = vadd.f32 %v1939_v45, %v1920_v46  ;;  %v1922_v52 = vpop.f32.mrb[3].mxu0  ;;  %v1966_v59 = vmul.f32 %v3317_v49, %v3317_v49 }
 0x463   : > { %v3323_v56 = vadd.f32 %v1943_v43, %v1922_v52  ;;  %v1954_v58 = vadd.f32 %v3319_v55, %v3317_v49  ;;  %v1967_v60 = vmul.f32 %v3319_v55, %v3319_v55 }
 0x464   : > { %v1968_v63 = vmul.f32 %v3321_v51, %v3321_v51 }
 0x465   : > { %1955 = vadd.xlane.f32.xlu0 %v1954_v58  ;;  %v1957_v22 = vadd.f32 %v3323_v56, %v3321_v51  ;;  %v1969_v0 = vmul.f32 %v3323_v56, %v3323_v56  ;;  %v1974_v3 = vadd.f32 %v1967_v60, %v1966_v59 }
 0x467   : > { %1958 = vadd.xlane.f32.xlu1 %v1957_v22  ;;  %v1926_v2 = vpop.f32.mrb[4].mxu0  ;;  %v1977_v7 = vadd.f32 %v1969_v0, %v1968_v63 }
 0x468   : > { %v3337_v4 = vadd.f32 %v1939_v45, %v1926_v2  ;;  %v1928_v5 = vpop.f32.mrb[5].mxu0 }
 0x469   : > { %v3339_v6 = vadd.f32 %v1943_v43, %v1928_v5  ;;  %1975 = vadd.xlane.f32.xlu0 %v1974_v3  ;;  %v1930_v39 = vpop.f32.mrb[6].mxu0 }
 0x46a   : > { %v3341_v42 = vadd.f32 %v1939_v45, %v1930_v39  ;;  %v1932_v8 = vpop.f32.mrb[7].mxu0  ;;  %v1970_v10 = vmul.f32 %v3337_v4, %v3337_v4 }
 0x46b   : > { %v3343_v1 = vadd.f32 %v1943_v43, %v1932_v8  ;;  %1978 = vadd.xlane.f32.xlu1 %v1977_v7  ;;  %v1960_v9 = vadd.f32 %v3339_v6, %v3337_v4  ;;  %v1971_v11 = vmul.f32 %v3339_v6, %v3339_v6 }
 0x46c   : > { %v1972_v35 = vmul.f32 %v3341_v42, %v3341_v42 }
 0x46d   : > { %1961 = vadd.xlane.f32.xlu0 %v1960_v9  ;;  %v1963_v33 = vadd.f32 %v3343_v1, %v3341_v42  ;;  %v1973_v12 = vmul.f32 %v3343_v1, %v3343_v1  ;;  %v1980_v13 = vadd.f32 %v1971_v11, %v1970_v10  ;;  %v739_v10 = vld [vmem:[%s3448_s12] sm:$0x3] }
 0x46e   : > { %v740_v11 = vld [vmem:[%s3487_s19] sm:$0x3] }
 0x46f   : > { %1964 = vadd.xlane.f32.xlu1 %v1963_v33  ;;  %v1983_v48 = vadd.f32 %v1973_v12, %v1972_v35  ;;  %v2053_v14 = vrot.slane %v740_v11, %v3165_v27  ;;  %v2057_v15 = vrot.slane %v740_v11, %v3170_v29 }
 0x471   : > { %1981 = vadd.xlane.f32.xlu0 %v1980_v13  ;;  %v2034_v13 = vrot.slane %v739_v10, %v3165_v27 }
 0x473   : > { %1984 = vadd.xlane.f32.xlu1 %v1983_v48  ;;  %v2038_v48 = vrot.slane %v739_v10, %v3170_v29 }
 0x4f2   : > { %v1956_v37 = vpop.xlane.xlu0 %1955 }
 0x4f3   : > { %v1986_v62 = vmul.f32 0.00390625, %v1956_v37 }
 0x4f4   : > { %v1959_v40 = vpop.xlane.xlu1 %1958 }
 0x4f5   : > { %v1987_v30 = vmul.f32 0.00390625, %v1959_v40  ;;  %v1994_v34 = vmul.f32 %v1986_v62, %v1986_v62  ;;  %v2006_v35 = vsub.f32 %v3317_v49, %v1986_v62  ;;  %v2007_v12 = vsub.f32 %v3319_v55, %v1986_v62 }
 0x4f6   : > { %v1976_v32 = vpop.xlane.xlu0 %1975 }
 0x4f7   : > { %v1990_v36 = vmul.f32 0.00390625, %v1976_v32  ;;  %v1995_v44 = vmul.f32 %v1987_v30, %v1987_v30  ;;  %v2008_v16 = vsub.f32 %v3321_v51, %v1987_v30  ;;  %v2009_v17 = vsub.f32 %v3323_v56, %v1987_v30 }
 0x4f8   : > { %v1979_v38 = vpop.xlane.xlu1 %1978 }
 0x4f9   : > { %v1998_v41 = vsub.f32 %v1990_v36, %v1994_v34  ;;  %v1991_v61 = vmul.f32 0.00390625, %v1979_v38 }
 0x4fa   : > { %v1962_v31 = vpop.xlane.xlu0 %1961 }
 0x4fb   : > { %v2002_v45 = vmax.f32 %v1998_v41, 0.0  ;;  %v1999_v43 = vsub.f32 %v1991_v61, %v1995_v44  ;;  %v1988_v47 = vmul.f32 0.00390625, %v1962_v31 }
 0x4fc   : > { %v1965_v53 = vpop.xlane.xlu1 %1964 }
 0x4fd   : > { %v2014_v46 = vadd.f32 1e-05, %v2002_v45  ;;  %v2003_v52 = vmax.f32 %v1999_v43, 0.0  ;;  %v1989_v58 = vmul.f32 0.00390625, %v1965_v53  ;;  %v1996_v22 = vmul.f32 %v1988_v47, %v1988_v47 }
 0x4fe   : > { %v1982_v59 = vpop.xlane.xlu0 %1981  ;;  %v2010_v57 = vsub.f32 %v3337_v4, %v1988_v47  ;;  %v2011_v27 = vsub.f32 %v3339_v6, %v1988_v47 }
 0x4ff   : > { %2803 = vrsqrt.f32 %v2014_v46  ;;  %v2015_v60 = vadd.f32 1e-05, %v2003_v52  ;;  %v1992_v63 = vmul.f32 0.00390625, %v1982_v59  ;;  %v1997_v3 = vmul.f32 %v1989_v58, %v1989_v58 }
 0x500   : > { %v1985_v0 = vpop.xlane.xlu1 %1984  ;;  %v2013_v56 = vsub.f32 %v3343_v1, %v1989_v58  ;;  %v2012_v38 = vsub.f32 %v3341_v42, %v1989_v58 }
 0x501   : > { %2805 = vrsqrt.f32 %v2015_v60  ;;  %v2000_v2 = vsub.f32 %v1992_v63, %v1996_v22  ;;  %v1993_v5 = vmul.f32 0.00390625, %v1985_v0  ;;  %v2523_v0 = vld [vmem:[%s3488_s25] ss:$0 sm:$0xff] }
 0x503   : > { %v2004_v39 = vmax.f32 %v2000_v2, 0.0  ;;  %v2001_v7 = vsub.f32 %v1993_v5, %v1997_v3 }
 0x505   : > { %v2016_v8 = vadd.f32 1e-05, %v2004_v39  ;;  %v2005_v9 = vmax.f32 %v2001_v7, 0.0 }
 0x507   : > { %2807 = vrsqrt.f32 %v2016_v8  ;;  %v2017_v33 = vadd.f32 1e-05, %v2005_v9  ;;  %v2540_v9 = vld [vmem:[%s3489_s23] ss:$0 sm:$0xff] }
 0x509   : > { %v2804_v50 = vpop.eup %2803  ;;  %2809 = vrsqrt.f32 %v2017_v33 }
 0x50a   : > { %v2022_v18 = vmul.f32 %v2804_v50, %v2006_v35  ;;  %v2023_v19 = vmul.f32 %v2804_v50, %v2007_v12 }
 0x50b   : > { %v2806_v20 = vpop.eup %2805 }
 0x50c   : > { %v2024_v49 = vmul.f32 %v2806_v20, %v2008_v16  ;;  %v2025_v21 = vmul.f32 %v2806_v20, %v2009_v17  ;;  %v2042_v55 = vmul.f32 %v2038_v48, %v2023_v19  ;;  %v2041_v23 = vmul.f32 %v2034_v13, %v2022_v18 }
 0x50e   : > { %v2044_v24 = vmul.f32 %v2038_v48, %v2025_v21  ;;  %v2061_v25 = vadd.f32 %v2057_v15, %v2042_v55  ;;  %v2043_v54 = vmul.f32 %v2034_v13, %v2024_v49  ;;  %v2060_v26 = vadd.f32 %v2053_v14, %v2041_v23  ;;  %v2541_v55 = vld [vmem:[#allocation2] ss:$0 sm:$0xff] }
 0x510   : > { %v2063_v29 = vadd.f32 %v2057_v15, %v2044_v24  ;;  %v2062_v28 = vadd.f32 %v2053_v14, %v2043_v54  ;;  %v2069_v37 = vmax.f32 %v2061_v25, 0.0  ;;  %v2068_v62 = vmax.f32 %v2060_v26, 0.0 }
 0x511   : > { %v2808_v51 = vpop.eup %2807 }
 0x512   : > { %v2071_v40 = vmax.f32 %v2063_v29, 0.0  ;;  %v2070_v30 = vmax.f32 %v2062_v28, 0.0  ;;  %v2027_v32 = vmul.f32 %v2808_v51, %v2011_v27  ;;  %v2026_v34 = vmul.f32 %v2808_v51, %v2010_v57 }
 0x513   : > { %v2810_v36 = vpop.eup %2809 }
 0x514   : > { %v2077_v41 = vpack.c.bf16 %v2071_v40, %v2069_v37  ;;  %v2076_v44 = vpack.c.bf16 %v2070_v30, %v2068_v62  ;;  %v2029_v61 = vmul.f32 %v2810_v36, %v2013_v56  ;;  %v2046_v4 = vmul.f32 %v2038_v48, %v2027_v32 }
 0x515   : > { %v2028_v31 = vmul.f32 %v2810_v36, %v2012_v38  ;;  %v2045_v6 = vmul.f32 %v2034_v13, %v2026_v34 }
 0x516   : > { %2246 = vmatprep.mubr.bf16.mxu1 %v2077_v41  ;;  %v2048_v45 = vmul.f32 %v2038_v48, %v2029_v61  ;;  %v2065_v43 = vadd.f32 %v2057_v15, %v2046_v4 }
 0x517   : > { %2247 = vmatmul.mubr.bf16.vlgmr.msra.gmra.mrb[24].mxu1 %v2076_v44  ;;  %v2047_v1 = vmul.f32 %v2034_v13, %v2028_v31  ;;  %v2064_v47 = vadd.f32 %v2053_v14, %v2045_v6 }
 0x518   : > { %v2067_v53 = vadd.f32 %v2057_v15, %v2048_v45  ;;  %v2073_v52 = vmax.f32 %v2065_v43, 0.0 }
 0x519   : > { %v2066_v46 = vadd.f32 %v2053_v14, %v2047_v1  ;;  %v2072_v60 = vmax.f32 %v2064_v47, 0.0 }
 0x51a   : > { %v2075_v59 = vmax.f32 %v2067_v53, 0.0 }
 0x51b   : > { %v2074_v22 = vmax.f32 %v2066_v46, 0.0 }
 0x51c   : > { %v2079_v63 = vpack.c.bf16 %v2075_v59, %v2073_v52 }
 0x51d   : > { %v2078_v42 = vpack.c.bf16 %v2074_v22, %v2072_v60 }
 0x51e   : > { %2254 = vmatprep.mubr.bf16.mxu1 %v2079_v63 }
 0x51f   : > { %2255 = vmatmul.mubr.bf16.gmra.mrb[28].mxu1 %v2078_v42 }
 0x5ea   : > { %v2560_v58 = vpop.f32.mrb[24].mxu1 }
 0x5eb   : > { %v2561_v2 = vpop.f32.mrb[25].mxu1 }
 0x5ec   : > { %v2562_v3 = vadd.f32 %v2561_v2, %v2560_v58  ;;  %v2563_v5 = vpop.f32.mrb[26].mxu1 }
 0x5ed   : > { %v2564_v39 = vpop.f32.mrb[27].mxu1 }
 0x5ee   : > { %v2249_v7 = vadd.f32 %v2562_v3, %v2523_v0  ;;  %v2565_v8 = vadd.f32 %v2564_v39, %v2563_v5 }
 0x5f0   : > { %v2263_v10 = vmax.f32 %v2249_v7, 0.0  ;;  %v2252_v11 = vadd.f32 %v2565_v8, %v2523_v0 }
 0x5f2   : > { %v2264_v33 = vmax.f32 %v2252_v11, 0.0  ;;  %v2566_v35 = vpop.f32.mrb[28].mxu1  ;;  %v2274_v12 = vmul.f32 %v2540_v9, %v2263_v10 }
 0x5f3   : > { %v2567_v13 = vpop.f32.mrb[29].mxu1 }
 0x5f4   : > { %v2568_v48 = vadd.f32 %v2567_v13, %v2566_v35  ;;  %2278 = vadd.xlane.f32.xlu0 %v2274_v12  ;;  %v2569_v50 = vpop.f32.mrb[30].mxu1  ;;  %v2275_v14 = vmul.f32 %v2540_v9, %v2264_v33 }
 0x5f5   : > { %v2570_v15 = vpop.f32.mrb[31].mxu1 }
 0x5f6   : > { %v2257_v16 = vadd.f32 %v2568_v48, %v2523_v0  ;;  %v2571_v17 = vadd.f32 %v2570_v15, %v2569_v50  ;;  %2280 = vadd.xlane.f32.xlu1 %v2275_v14 }
 0x5f8   : > { %v2265_v18 = vmax.f32 %v2257_v16, 0.0  ;;  %v2260_v19 = vadd.f32 %v2571_v17, %v2523_v0 }
 0x5fa   : > { %v2266_v20 = vmax.f32 %v2260_v19, 0.0  ;;  %v2276_v49 = vmul.f32 %v2540_v9, %v2265_v18 }
 0x5fc   : > { %2282 = vadd.xlane.f32.xlu0 %v2276_v49  ;;  %v2277_v21 = vmul.f32 %v2540_v9, %v2266_v20 }
 0x5fe   : > { %2284 = vadd.xlane.f32.xlu1 %v2277_v21 }
 0x681   : > { %v2279_v23 = vpop.xlane.xlu0 %2278 }
 0x682   : > { %v2292_v24 = vadd.f32 %v2541_v55, %v2279_v23 }
 0x683   : > { %v2281_v25 = vpop.xlane.xlu1 %2280 }
 0x684   : > { %2297 = vst.msk [vmem:[%s726_s30] sm:$0xff] %vm2296_vm4, %v2292_v24  ;;  %v2293_v54 = vadd.f32 %v2541_v55, %v2281_v25 }
 0x686   : > { %2298 = vst.msk [vmem:[%s726_s30 + $0x8] sm:$0xff] %vm2296_vm4, %v2293_v54 }
 0x689   : > { %v2283_v26 = vpop.xlane.xlu0 %2282 }
 0x68a   : > { %v2294_v57 = vadd.f32 %v2541_v55, %v2283_v26 }
 0x68b   : > { %v2285_v27 = vpop.xlane.xlu1 %2284 }
 0x68c   : > { %2299 = vst.msk [vmem:[%s726_s30 + $0x10] sm:$0xff] %vm2296_vm4, %v2294_v57  ;;  %v2295_v29 = vadd.f32 %v2541_v55, %v2285_v27 }
 0x68e   : > { %2300 = vst.msk [vmem:[%s726_s30 + $0x18] sm:$0xff] %vm2296_vm4, %v2295_v29 }
 0x68f PF: > { %s35_s26 = sadd.s32 1, %s2909_s26  }
 0x690   : > { %p32_p3 = scmp.ge.s32.totalorder %s35_s26, 4  }
 0x692   :  { %34 = sbr.rel (!%p32_p3) target bundleno = 13 (0xd), region = 150 }
 0x699   :  { %2323 = vsyncpa [#allocation4], 1 }
 0x69a   :  { %2325 = vsyncpa [#allocation4 + $0x1], 1 }
 0x69b   :  { %2326 = vsyncpa [#allocation6], 1 }

</bundles_post_ra>
